<compile_context>
chip_gen: v7x
topology: tpu7x:2x2x1
jax: 0.10.0
libtpu: 0.0.40
codegen_flags: <defaults>
</compile_context>

<pallas_src>
import functools

import numpy as np
import jax
import jax.numpy as jnp
from jax.experimental import pallas as pl
from jax.experimental.pallas import tpu as pltpu


# ----------------------------------------------------------------------------- fused kernel
def _fused_kernel(*refs, n_heads, d_k, d_v, has_mask):
    if has_mask:
        ctx_ref, env_ref, mask_ref = refs[0], refs[1], refs[2]
        rest = refs[3:]
    else:
        ctx_ref, env_ref = refs[0], refs[1]
        mask_ref = None
        rest = refs[2:]

    (emb_w1_ref, emb_w2_ref, emb_b1_ref, emb_b2_ref, emb_g_ref, emb_be_ref,
     fin_g_ref, fin_be_ref,
     wq_ref, wkv_ref, wo_ref, fw1_ref, fw2_ref,
     bq_ref, bkv_ref, bo_ref, ag_ref, abe_ref,
     fb1_ref, fb2_ref, fg_ref, fbe_ref,
     o_ref, cur_ref) = rest

    H, dk, dv = n_heads, d_k, d_v
    n_qk = H * dk
    scale = 1.0 / float(dk) ** 0.5

    layer = pl.program_id(1)
    n_layer_steps = pl.num_programs(1)

    def _ln(y, g, b, eps):
        mu = jnp.mean(y, axis=-1, keepdims=True)
        var = jnp.mean(jnp.square(y - mu), axis=-1, keepdims=True)
        return (y - mu) * jax.lax.rsqrt(var + eps) * g + b

    # ---- to_latent_embedding: Linear -> ReLU -> Linear -> Dropout(id) -> LayerNorm(1e-5)
    #      Runs only at the first layer step of each batch; result persists in VMEM scratch.
    @pl.when(layer == 0)
    def _embed():
        x = ctx_ref[0].astype(jnp.float32)                                   # (Lc, d_context)
        h = jnp.maximum(
            jnp.dot(x, emb_w1_ref[...].astype(jnp.float32),
                    preferred_element_type=jnp.float32) + emb_b1_ref[...], 0.0)
        y = jnp.dot(h, emb_w2_ref[...].astype(jnp.float32),
                    preferred_element_type=jnp.float32) + emb_b2_ref[...]
        cur_ref[...] = _ln(y, emb_g_ref[...], emb_be_ref[...], 1e-5)         # (Lc, D)

    cur = cur_ref[...]                                                       # (Lc, D)
    e = env_ref[0].astype(jnp.float32)                                       # (Le, D)

    # ---- cross attention (one decoder layer per grid step along the layer axis)
    # wide projections: q from context, fused k/v from env
    q = jnp.dot(cur, wq_ref[0].astype(jnp.float32),
                preferred_element_type=jnp.float32) + bq_ref[0]              # (Lc, H*dk)
    q = q * scale
    kv = jnp.dot(e, wkv_ref[0].astype(jnp.float32),
                 preferred_element_type=jnp.float32) + bkv_ref[0]            # (Le, H*dk + H*dv)

    # heads batched on a leading axis (lane slices become lane-aligned at production head dims)
    qh = jnp.stack([q[:, h * dk:(h + 1) * dk] for h in range(H)], axis=0)            # (H, Lc, dk)
    kh = jnp.stack([kv[:, h * dk:(h + 1) * dk] for h in range(H)], axis=0)           # (H, Le, dk)
    vh = jnp.stack([kv[:, n_qk + h * dv:n_qk + (h + 1) * dv] for h in range(H)],
                   axis=0)                                                            # (H, Le, dv)

    s = jnp.einsum('hqd,hkd->hqk', qh, kh,
                   preferred_element_type=jnp.float32)                       # (H, Lc, Le)
    if has_mask:
        # additive bias computed once and broadcast over heads/queries
        s = s + jnp.where(mask_ref[...] == 0, -1e9, 0.0)
    s = s - jnp.max(s, axis=-1, keepdims=True)
    p = jnp.exp(s)
    p = p * pl.reciprocal(jnp.sum(p, axis=-1, keepdims=True), approx=True)
    ctx_h = jnp.einsum('hqk,hkd->hqd', p, vh,
                       preferred_element_type=jnp.float32)                   # (H, Lc, dv)

    # single wide output projection against full Wo
    ctx2 = jnp.concatenate([ctx_h[h] for h in range(H)], axis=-1)            # (Lc, H*dv)
    attn = jnp.dot(ctx2, wo_ref[0].astype(jnp.float32),
                   preferred_element_type=jnp.float32) + bo_ref[0]
    cur = _ln(attn + cur, ag_ref[0], abe_ref[0], 1e-6)                       # dropout = identity

    # ---- position-wise FFN
    h1 = jnp.maximum(jnp.dot(cur, fw1_ref[0].astype(jnp.float32),
                             preferred_element_type=jnp.float32) + fb1_ref[0], 0.0)
    cur = _ln(jnp.dot(h1, fw2_ref[0].astype(jnp.float32),
                      preferred_element_type=jnp.float32) + fb2_ref[0] + cur,
              fg_ref[0], fbe_ref[0], 1e-6)
    cur_ref[...] = cur

    # ---- final LayerNorm(eps=1e-6): store only at the last layer step of each batch
    @pl.when(layer == n_layer_steps - 1)
    def _final():
        o_ref[0] = _ln(cur, fin_g_ref[...], fin_be_ref[...], 1e-6).astype(o_ref.dtype)


# ----------------------------------------------------------------------------- wrapper
def context_encoder_forward(context, env_encoding, env_encoding_mask, packed,
                            *, n_layers, n_heads, d_k, d_v):
    """Mirrors ContextEncoder.forward; returns a 1-tuple (context_embedding,)."""
    B, Lc, d_context = context.shape
    _, Le, d_model = env_encoding.shape
    has_mask = env_encoding_mask is not None

    kern = functools.partial(_fused_kernel, n_heads=n_heads, d_k=d_k, d_v=d_v,
                             has_mask=has_mask)

    args = [context, env_encoding]
    in_specs = [pl.BlockSpec((1, Lc, d_context), lambda b, l: (b, 0, 0)),
                pl.BlockSpec((1, Le, d_model), lambda b, l: (b, 0, 0))]

    if has_mask:
        m = jnp.asarray(env_encoding_mask)
        if m.ndim == 2:                              # (B, Le) -> (B, 1, Le)
            m = m[:, None, :]
        Lq = m.shape[1]                              # 1 or Lc; no Lc-wide broadcast materialized
        m = jnp.broadcast_to(m, (B, Lq, Le)).astype(jnp.int32)
        args.append(m)
        in_specs.append(pl.BlockSpec((1, Lq, Le), lambda b, l: (b, 0, 0)))

    shared_names = ("emb_w1", "emb_w2", "emb_b1", "emb_b2", "emb_g", "emb_be",
                    "fin_g", "fin_be")
    layer_names = ("wq", "wkv", "wo", "fw1", "fw2",
                   "bq", "bkv", "bo", "ag", "abe", "fb1", "fb2", "fg", "fbe")

    for name in shared_names:                        # resident across the whole grid
        a = packed[name]
        args.append(a)
        in_specs.append(pl.BlockSpec(a.shape, lambda b, l, _n=a.ndim: (0,) * _n))
    for name in layer_names:                         # streamed one layer at a time
        a = packed[name]
        args.append(a)
        in_specs.append(pl.BlockSpec((1,) + a.shape[1:],
                                     lambda b, l, _n=a.ndim - 1: (l,) + (0,) * _n))

    out = pl.pallas_call(
        kern,
        out_shape=jax.ShapeDtypeStruct((B, Lc, d_model), jnp.float32),
        grid=(B, n_layers),
        in_specs=in_specs,
        out_specs=pl.BlockSpec((1, Lc, d_model), lambda b, l: (b, 0, 0)),
        scratch_shapes=[pltpu.VMEM((Lc, d_model), jnp.float32)],
        compiler_params=pltpu.CompilerParams(
            dimension_semantics=("parallel", "arbitrary"),
            vmem_limit_bytes=32 * 1024 * 1024),
    )(*args)
    return (out,)


# ----------------------------------------------------------------------------- params
def init_params(key, d_context, d_model, d_inner, d_k, d_v, n_heads, n_layers):
    cnt = [0]

    def nk():
        cnt[0] += 1
        return jax.random.fold_in(key, cnt[0])

    def lin(din, dout):
        w = 0.05 * jax.random.normal(nk(), (din, dout), jnp.float32)
        b = 0.05 * jax.random.normal(nk(), (1, dout), jnp.float32)
        return w, b

    def ln(d):
        g = 1.0 + 0.05 * jax.random.normal(nk(), (1, d), jnp.float32)
        b = 0.05 * jax.random.normal(nk(), (1, d), jnp.float32)
        return g, b

    p = {}
    p["emb_w1"], p["emb_b1"] = lin(d_context, d_inner)
    p["emb_w2"], p["emb_b2"] = lin(d_inner, d_model)
    p["emb_g"], p["emb_be"] = ln(d_model)
    p["layers"] = []
    for _ in range(n_layers):
        L = {}
        L["wq"], L["bq"] = lin(d_model, n_heads * d_k)
        L["wk"], L["bk"] = lin(d_model, n_heads * d_k)
        L["wv"], L["bv"] = lin(d_model, n_heads * d_v)
        L["wo"], L["bo"] = lin(n_heads * d_v, d_model)
        L["attn_g"], L["attn_be"] = ln(d_model)
        L["ffn_w1"], L["ffn_b1"] = lin(d_model, d_inner)
        L["ffn_w2"], L["ffn_b2"] = lin(d_inner, d_model)
        L["ffn_g"], L["ffn_be"] = ln(d_model)
        p["layers"].append(L)
    p["final_g"], p["final_be"] = ln(d_model)
    return p


def pack_params(p, *, weight_dtype=jnp.bfloat16):
    """Stack per-layer weights on a leading layer axis (streamed over the layer grid axis).

    Weight matrices are stored in `weight_dtype` (bf16 halves weight DMA / residency);
    all bias / LayerNorm vectors stay fp32 and each is its own (n_layers, 1, dim) array so
    there is no sub-lane slicing of a packed blob inside the kernel.
    """
    wdt = weight_dtype

    def stack(key):
        return jnp.stack([L[key] for L in p["layers"]])

    return {
        # shared (used once per batch)
        "emb_w1": p["emb_w1"].astype(wdt), "emb_w2": p["emb_w2"].astype(wdt),
        "emb_b1": p["emb_b1"], "emb_b2": p["emb_b2"],
        "emb_g": p["emb_g"], "emb_be": p["emb_be"],
        "fin_g": p["final_g"], "fin_be": p["final_be"],
        # per-layer matrices (streamed)
        "wq": stack("wq").astype(wdt),                                         # (L, D, H*dk)
        "wkv": jnp.stack([jnp.concatenate([L["wk"], L["wv"]], axis=-1)
                          for L in p["layers"]]).astype(wdt),                  # (L, D, H*dk+H*dv)
        "wo": stack("wo").astype(wdt),                                         # (L, H*dv, D)
        "fw1": stack("ffn_w1").astype(wdt),                                    # (L, D, Di)
        "fw2": stack("ffn_w2").astype(wdt),                                    # (L, Di, D)
        # per-layer vectors (fp32)
        "bq": stack("bq"),
        "bkv": jnp.stack([jnp.concatenate([L["bk"], L["bv"]], axis=-1)
                          for L in p["layers"]]),
        "bo": stack("bo"),
        "ag": stack("attn_g"), "abe": stack("attn_be"),
        "fb1": stack("ffn_b1"), "fb2": stack("ffn_b2"),
        "fg": stack("ffn_g"), "fbe": stack("ffn_be"),
    }


# ----------------------------------------------------------------------------- pure-JAX reference
def _ln_ref(x, g, b, eps):
    mu = x.mean(-1, keepdims=True)
    var = ((x - mu) ** 2).mean(-1, keepdims=True)
    return (x - mu) / jnp.sqrt(var + eps) * g + b


def ref_forward(context, env, mask, p, n_heads, d_k, d_v, weight_dtype=jnp.float32):
    """Reference forward. weight_dtype != fp32 rounds the weight MATRICES through that dtype
    (matching the kernel's storage precision) while keeping all math in fp32."""
    def rw(w):
        return w.astype(weight_dtype).astype(jnp.float32) if weight_dtype != jnp.float32 else w

    B, Lc, _ = context.shape
    Le = env.shape[1]
    h = jnp.maximum(context @ rw(p["emb_w1"]) + p["emb_b1"], 0.0)
    x = _ln_ref(h @ rw(p["emb_w2"]) + p["emb_b2"], p["emb_g"], p["emb_be"], 1e-5)
    for L in p["layers"]:
        q = (x @ rw(L["wq"]) + L["bq"]).reshape(B, Lc, n_heads, d_k).transpose(0, 2, 1, 3)
        k = (env @ rw(L["wk"]) + L["bk"]).reshape(B, Le, n_heads, d_k).transpose(0, 2, 1, 3)
        v = (env @ rw(L["wv"]) + L["bv"]).reshape(B, Le, n_heads, d_v).transpose(0, 2, 1, 3)
        s = jnp.einsum("bhqd,bhkd->bhqk", q, k) / (float(d_k) ** 0.5)
        if mask is not None:
            m = jnp.broadcast_to(mask.astype(jnp.float32), (B, Lc, Le))[:, None]
            s = jnp.where(m == 0.0, -1e9, s)
        a = jax.nn.softmax(s, axis=-1)
        o = jnp.einsum("bhqk,bhkd->bhqd", a, v).transpose(0, 2, 1, 3).reshape(B, Lc, n_heads * d_v)
        x = _ln_ref(o @ rw(L["wo"]) + L["bo"] + x, L["attn_g"], L["attn_be"], 1e-6)
        f = jnp.maximum(x @ rw(L["ffn_w1"]) + L["ffn_b1"], 0.0) @ rw(L["ffn_w2"]) + L["ffn_b2"]
        x = _ln_ref(f + x, L["ffn_g"], L["ffn_be"], 1e-6)
    return (_ln_ref(x, p["final_g"], p["final_be"], 1e-6),)


# ----------------------------------------------------------------------------- main
if __name__ == "__main__":
    B, Lc, Le = 2, 8, 16
    d_context, d_model, d_inner = 4, 32, 64
    d_k = d_v = 8
    n_heads, n_layers = 4, 2

    key = jax.random.PRNGKey(0)
    k_ctx, k_env, k_par = jax.random.split(key, 3)
    context = jax.random.normal(k_ctx, (B, Lc, d_context), jnp.float32)
    env_encoding = jax.random.normal(k_env, (B, Le, d_model), jnp.float32)
    params = init_params(k_par, d_context, d_model, d_inner, d_k, d_v, n_heads, n_layers)
    mask = jnp.ones((B, 1, Le), jnp.float32).at[:, :, Le - 4:].set(0.0)

    # Tolerance covers the EUP approximate softmax reciprocal and fp32 accumulation-order
    # differences; semantic errors would be orders of magnitude larger.
    TOL = 2e-3
    fwd = functools.partial(context_encoder_forward,
                            n_layers=n_layers, n_heads=n_heads, d_k=d_k, d_v=d_v)

    # 1) fp32 weights, maskless fast path (no mask DMA'd or selected against)
    packed32 = pack_params(params, weight_dtype=jnp.float32)
    (out,) = fwd(context, env_encoding, None, packed32)
    out = jax.block_until_ready(out)
    (ref,) = ref_forward(context, env_encoding, None, params, n_heads, d_k, d_v)
    np.testing.assert_allclose(np.asarray(out), np.asarray(ref), rtol=TOL, atol=TOL)

    # 2) fp32 weights, masked path (last 4 env positions masked out)
    (out_m,) = fwd(context, env_encoding, mask, packed32)
    out_m = jax.block_until_ready(out_m)
    (ref_m,) = ref_forward(context, env_encoding, mask, params, n_heads, d_k, d_v)
    np.testing.assert_allclose(np.asarray(out_m), np.asarray(ref_m), rtol=TOL, atol=TOL)

    # 3) bf16-stored weights (halved weight DMA / residency), masked; reference uses
    #    identically rounded weights so the comparison isolates kernel-vs-reference math.
    packed16 = pack_params(params, weight_dtype=jnp.bfloat16)
    (out_b,) = fwd(context, env_encoding, mask, packed16)
    out_b = jax.block_until_ready(out_b)
    (ref_b,) = ref_forward(context, env_encoding, mask, params, n_heads, d_k, d_v,
                           weight_dtype=jnp.bfloat16)
    np.testing.assert_allclose(np.asarray(out_b), np.asarray(ref_b), rtol=TOL, atol=TOL)

    print("KERNEL_OK")
</pallas_src>

<mosaic_0001>
module attributes {stable_mosaic.version = 11 : i64} {
  func.func @_fused_kernel(%arg0: i32, %arg1: i32, %arg2: memref<1x8x4xf32, #tpu.memory_space<vmem>>, %arg3: memref<1x16x32xf32, #tpu.memory_space<vmem>>, %arg4: memref<4x64xf32, #tpu.memory_space<vmem>>, %arg5: memref<64x32xf32, #tpu.memory_space<vmem>>, %arg6: memref<1x64xf32, #tpu.memory_space<vmem>>, %arg7: memref<1x32xf32, #tpu.memory_space<vmem>>, %arg8: memref<1x32xf32, #tpu.memory_space<vmem>>, %arg9: memref<1x32xf32, #tpu.memory_space<vmem>>, %arg10: memref<1x32xf32, #tpu.memory_space<vmem>>, %arg11: memref<1x32xf32, #tpu.memory_space<vmem>>, %arg12: memref<1x32x32xf32, #tpu.memory_space<vmem>>, %arg13: memref<1x32x64xf32, #tpu.memory_space<vmem>>, %arg14: memref<1x32x32xf32, #tpu.memory_space<vmem>>, %arg15: memref<1x32x64xf32, #tpu.memory_space<vmem>>, %arg16: memref<1x64x32xf32, #tpu.memory_space<vmem>>, %arg17: memref<1x1x32xf32, #tpu.memory_space<vmem>>, %arg18: memref<1x1x64xf32, #tpu.memory_space<vmem>>, %arg19: memref<1x1x32xf32, #tpu.memory_space<vmem>>, %arg20: memref<1x1x32xf32, #tpu.memory_space<vmem>>, %arg21: memref<1x1x32xf32, #tpu.memory_space<vmem>>, %arg22: memref<1x1x64xf32, #tpu.memory_space<vmem>>, %arg23: memref<1x1x32xf32, #tpu.memory_space<vmem>>, %arg24: memref<1x1x32xf32, #tpu.memory_space<vmem>>, %arg25: memref<1x1x32xf32, #tpu.memory_space<vmem>>, %arg26: memref<1x8x32xf32, #tpu.memory_space<vmem>>, %arg27: memref<8x32xf32, #tpu.memory_space<vmem>>) attributes {dimension_semantics = [#tpu.dimension_semantics<parallel>, #tpu.dimension_semantics<arbitrary>], iteration_bounds = array<i64: 2, 2>, scalar_prefetch = 0 : i64, scratch_operands = 1 : i64, tpu.core_type = #tpu.core_type<tc>, window_params = [{transform_indices = @transform_0, window_bounds = array<i64: 1, 8, 4>}, {transform_indices = @transform_1, window_bounds = array<i64: 1, 16, 32>}, {pipeline_mode = #tpu.pipeline_mode<synchronous>, transform_indices = @transform_2, window_bounds = array<i64: 4, 64>}, {pipeline_mode = #tpu.pipeline_mode<synchronous>, transform_indices = @transform_3, window_bounds = array<i64: 64, 32>}, {pipeline_mode = #tpu.pipeline_mode<synchronous>, transform_indices = @transform_4, window_bounds = array<i64: 1, 64>}, {pipeline_mode = #tpu.pipeline_mode<synchronous>, transform_indices = @transform_5, window_bounds = array<i64: 1, 32>}, {pipeline_mode = #tpu.pipeline_mode<synchronous>, transform_indices = @transform_6, window_bounds = array<i64: 1, 32>}, {pipeline_mode = #tpu.pipeline_mode<synchronous>, transform_indices = @transform_7, window_bounds = array<i64: 1, 32>}, {pipeline_mode = #tpu.pipeline_mode<synchronous>, transform_indices = @transform_8, window_bounds = array<i64: 1, 32>}, {pipeline_mode = #tpu.pipeline_mode<synchronous>, transform_indices = @transform_9, window_bounds = array<i64: 1, 32>}, {transform_indices = @transform_10, window_bounds = array<i64: 1, 32, 32>}, {transform_indices = @transform_11, window_bounds = array<i64: 1, 32, 64>}, {transform_indices = @transform_12, window_bounds = array<i64: 1, 32, 32>}, {transform_indices = @transform_13, window_bounds = array<i64: 1, 32, 64>}, {transform_indices = @transform_14, window_bounds = array<i64: 1, 64, 32>}, {transform_indices = @transform_15, window_bounds = array<i64: 1, 1, 32>}, {transform_indices = @transform_16, window_bounds = array<i64: 1, 1, 64>}, {transform_indices = @transform_17, window_bounds = array<i64: 1, 1, 32>}, {transform_indices = @transform_18, window_bounds = array<i64: 1, 1, 32>}, {transform_indices = @transform_19, window_bounds = array<i64: 1, 1, 32>}, {transform_indices = @transform_20, window_bounds = array<i64: 1, 1, 64>}, {transform_indices = @transform_21, window_bounds = array<i64: 1, 1, 32>}, {transform_indices = @transform_22, window_bounds = array<i64: 1, 1, 32>}, {transform_indices = @transform_23, window_bounds = array<i64: 1, 1, 32>}, {transform_indices = @transform_24, window_bounds = array<i64: 1, 8, 32>}]} {
    %c0_i32 = arith.constant 0 : i32
    %0 = arith.cmpi eq, %arg1, %c0_i32 : i32
    %1 = arith.extui %0 : i1 to i32
    %c0_i32_0 = arith.constant 0 : i32
    %2 = arith.cmpi ne, %1, %c0_i32_0 : i32
    scf.if %2 {
      %c0_70 = arith.constant 0 : index
      %c0_71 = arith.constant 0 : index
      %c0_72 = arith.constant 0 : index
      %151 = vector.load %arg2[%c0_70, %c0_71, %c0_72] : memref<1x8x4xf32, #tpu.memory_space<vmem>>, vector<1x8x4xf32>
      %152 = vector.shape_cast %151 : vector<1x8x4xf32> to vector<8x4xf32>
      %c0_73 = arith.constant 0 : index
      %c0_74 = arith.constant 0 : index
      %153 = vector.load %arg4[%c0_73, %c0_74] : memref<4x64xf32, #tpu.memory_space<vmem>>, vector<4x64xf32>
      %cst_75 = arith.constant dense<0.000000e+00> : vector<8x64xf32>
      %154 = tpu.matmul %152, %153, %cst_75 {dimension_numbers = #tpu.dot_dimension_numbers<[1], [0], [0], [1], [0, 0, 1, 1], [], []>} : vector<8x4xf32>, vector<4x64xf32>, vector<8x64xf32> -> vector<8x64xf32>
      %c0_76 = arith.constant 0 : index
      %c0_77 = arith.constant 0 : index
      %155 = vector.load %arg6[%c0_76, %c0_77] : memref<1x64xf32, #tpu.memory_space<vmem>>, vector<1x64xf32>
      %156 = vector.broadcast %155 : vector<1x64xf32> to vector<8x64xf32>
      %157 = arith.addf %154, %156 : vector<8x64xf32>
      %cst_78 = arith.constant 0.000000e+00 : f32
      %158 = vector.broadcast %cst_78 : f32 to vector<8x64xf32>
      %159 = arith.maximumf %157, %158 : vector<8x64xf32>
      %c0_79 = arith.constant 0 : index
      %c0_80 = arith.constant 0 : index
      %160 = vector.load %arg5[%c0_79, %c0_80] : memref<64x32xf32, #tpu.memory_space<vmem>>, vector<64x32xf32>
      %cst_81 = arith.constant dense<0.000000e+00> : vector<8x32xf32>
      %161 = tpu.matmul %159, %160, %cst_81 {dimension_numbers = #tpu.dot_dimension_numbers<[1], [0], [0], [1], [0, 0, 1, 1], [], []>} : vector<8x64xf32>, vector<64x32xf32>, vector<8x32xf32> -> vector<8x32xf32>
      %c0_82 = arith.constant 0 : index
      %c0_83 = arith.constant 0 : index
      %162 = vector.load %arg7[%c0_82, %c0_83] : memref<1x32xf32, #tpu.memory_space<vmem>>, vector<1x32xf32>
      %163 = vector.broadcast %162 : vector<1x32xf32> to vector<8x32xf32>
      %164 = arith.addf %161, %163 : vector<8x32xf32>
      %c0_84 = arith.constant 0 : index
      %c0_85 = arith.constant 0 : index
      %165 = vector.load %arg8[%c0_84, %c0_85] : memref<1x32xf32, #tpu.memory_space<vmem>>, vector<1x32xf32>
      %c0_86 = arith.constant 0 : index
      %c0_87 = arith.constant 0 : index
      %166 = vector.load %arg9[%c0_86, %c0_87] : memref<1x32xf32, #tpu.memory_space<vmem>>, vector<1x32xf32>
      %cst_88 = arith.constant dense<0.000000e+00> : vector<8xf32>
      %167 = vector.multi_reduction <add>, %164, %cst_88 [1] : vector<8x32xf32> to vector<8xf32>
      %168 = vector.shape_cast %167 : vector<8xf32> to vector<8x1xf32>
      %cst_89 = arith.constant 3.200000e+01 : f32
      %169 = vector.broadcast %cst_89 : f32 to vector<8x1xf32>
      %170 = arith.divf %168, %169 : vector<8x1xf32>
      %171 = vector.broadcast %170 : vector<8x1xf32> to vector<8x32xf32>
      %172 = arith.subf %164, %171 : vector<8x32xf32>
      %173 = arith.mulf %172, %172 : vector<8x32xf32>
      %cst_90 = arith.constant dense<0.000000e+00> : vector<8xf32>
      %174 = vector.multi_reduction <add>, %173, %cst_90 [1] : vector<8x32xf32> to vector<8xf32>
      %175 = vector.shape_cast %174 : vector<8xf32> to vector<8x1xf32>
      %cst_91 = arith.constant 3.200000e+01 : f32
      %176 = vector.broadcast %cst_91 : f32 to vector<8x1xf32>
      %177 = arith.divf %175, %176 : vector<8x1xf32>
      %178 = vector.broadcast %170 : vector<8x1xf32> to vector<8x32xf32>
      %179 = arith.subf %164, %178 : vector<8x32xf32>
      %cst_92 = arith.constant 9.99999974E-6 : f32
      %180 = vector.broadcast %cst_92 : f32 to vector<8x1xf32>
      %181 = arith.addf %177, %180 : vector<8x1xf32>
      %182 = math.rsqrt %181 : vector<8x1xf32>
      %183 = vector.broadcast %182 : vector<8x1xf32> to vector<8x32xf32>
      %184 = arith.mulf %179, %183 : vector<8x32xf32>
      %185 = vector.broadcast %165 : vector<1x32xf32> to vector<8x32xf32>
      %186 = arith.mulf %184, %185 : vector<8x32xf32>
      %187 = vector.broadcast %166 : vector<1x32xf32> to vector<8x32xf32>
      %188 = arith.addf %186, %187 : vector<8x32xf32>
      %c0_93 = arith.constant 0 : index
      %c0_94 = arith.constant 0 : index
      %189 = vector.load %arg27[%c0_93, %c0_94] : memref<8x32xf32, #tpu.memory_space<vmem>>, vector<8x32xf32>
      tpu.vector_store %arg27[%c0_93, %c0_94], %188 {strides = array<i32>} : memref<8x32xf32, #tpu.memory_space<vmem>>, vector<8x32xf32>,
    } else {
    }
    %c0 = arith.constant 0 : index
    %c0_1 = arith.constant 0 : index
    %3 = vector.load %arg27[%c0, %c0_1] : memref<8x32xf32, #tpu.memory_space<vmem>>, vector<8x32xf32>
    %c0_2 = arith.constant 0 : index
    %c0_3 = arith.constant 0 : index
    %c0_4 = arith.constant 0 : index
    %4 = vector.load %arg3[%c0_2, %c0_3, %c0_4] : memref<1x16x32xf32, #tpu.memory_space<vmem>>, vector<1x16x32xf32>
    %5 = vector.shape_cast %4 : vector<1x16x32xf32> to vector<16x32xf32>
    %c0_5 = arith.constant 0 : index
    %c0_6 = arith.constant 0 : index
    %c0_7 = arith.constant 0 : index
    %6 = vector.load %arg12[%c0_5, %c0_6, %c0_7] : memref<1x32x32xf32, #tpu.memory_space<vmem>>, vector<1x32x32xf32>
    %7 = vector.shape_cast %6 : vector<1x32x32xf32> to vector<32x32xf32>
    %cst = arith.constant dense<0.000000e+00> : vector<8x32xf32>
    %8 = tpu.matmul %3, %7, %cst {dimension_numbers = #tpu.dot_dimension_numbers<[1], [0], [0], [1], [0, 0, 1, 1], [], []>} : vector<8x32xf32>, vector<32x32xf32>, vector<8x32xf32> -> vector<8x32xf32>
    %c0_8 = arith.constant 0 : index
    %c0_9 = arith.constant 0 : index
    %c0_10 = arith.constant 0 : index
    %9 = vector.load %arg17[%c0_8, %c0_9, %c0_10] : memref<1x1x32xf32, #tpu.memory_space<vmem>>, vector<1x1x32xf32>
    %10 = vector.shape_cast %9 : vector<1x1x32xf32> to vector<1x32xf32>
    %11 = vector.broadcast %10 : vector<1x32xf32> to vector<8x32xf32>
    %12 = arith.addf %8, %11 : vector<8x32xf32>
    %cst_11 = arith.constant 0.353553385 : f32
    %13 = vector.broadcast %cst_11 : f32 to vector<8x32xf32>
    %14 = arith.mulf %12, %13 : vector<8x32xf32>
    %c0_12 = arith.constant 0 : index
    %c0_13 = arith.constant 0 : index
    %c0_14 = arith.constant 0 : index
    %15 = vector.load %arg13[%c0_12, %c0_13, %c0_14] : memref<1x32x64xf32, #tpu.memory_space<vmem>>, vector<1x32x64xf32>
    %16 = vector.shape_cast %15 : vector<1x32x64xf32> to vector<32x64xf32>
    %cst_15 = arith.constant dense<0.000000e+00> : vector<16x64xf32>
    %17 = tpu.matmul %5, %16, %cst_15 {dimension_numbers = #tpu.dot_dimension_numbers<[1], [0], [0], [1], [0, 0, 1, 1], [], []>} : vector<16x32xf32>, vector<32x64xf32>, vector<16x64xf32> -> vector<16x64xf32>
    %c0_16 = arith.constant 0 : index
    %c0_17 = arith.constant 0 : index
    %c0_18 = arith.constant 0 : index
    %18 = vector.load %arg18[%c0_16, %c0_17, %c0_18] : memref<1x1x64xf32, #tpu.memory_space<vmem>>, vector<1x1x64xf32>
    %19 = vector.shape_cast %18 : vector<1x1x64xf32> to vector<1x64xf32>
    %20 = vector.broadcast %19 : vector<1x64xf32> to vector<16x64xf32>
    %21 = arith.addf %17, %20 : vector<16x64xf32>
    %22 = vector.extract_strided_slice %14 {offsets = [0, 0], sizes = [8, 8], strides = [1, 1]} : vector<8x32xf32> to vector<8x8xf32>
    %23 = vector.extract_strided_slice %14 {offsets = [0, 8], sizes = [8, 8], strides = [1, 1]} : vector<8x32xf32> to vector<8x8xf32>
    %24 = vector.extract_strided_slice %14 {offsets = [0, 16], sizes = [8, 8], strides = [1, 1]} : vector<8x32xf32> to vector<8x8xf32>
    %25 = vector.extract_strided_slice %14 {offsets = [0, 24], sizes = [8, 8], strides = [1, 1]} : vector<8x32xf32> to vector<8x8xf32>
    %26 = vector.shape_cast %22 : vector<8x8xf32> to vector<1x8x8xf32>
    %27 = vector.shape_cast %23 : vector<8x8xf32> to vector<1x8x8xf32>
    %28 = vector.shape_cast %24 : vector<8x8xf32> to vector<1x8x8xf32>
    %29 = vector.shape_cast %25 : vector<8x8xf32> to vector<1x8x8xf32>
    %30 = tpu.concatenate %26, %27, %28, %29 in 0 : vector<1x8x8xf32>, vector<1x8x8xf32>, vector<1x8x8xf32>, vector<1x8x8xf32> -> vector<4x8x8xf32>
    %31 = vector.extract_strided_slice %21 {offsets = [0, 0], sizes = [16, 8], strides = [1, 1]} : vector<16x64xf32> to vector<16x8xf32>
    %32 = vector.extract_strided_slice %21 {offsets = [0, 8], sizes = [16, 8], strides = [1, 1]} : vector<16x64xf32> to vector<16x8xf32>
    %33 = vector.extract_strided_slice %21 {offsets = [0, 16], sizes = [16, 8], strides = [1, 1]} : vector<16x64xf32> to vector<16x8xf32>
    %34 = vector.extract_strided_slice %21 {offsets = [0, 24], sizes = [16, 8], strides = [1, 1]} : vector<16x64xf32> to vector<16x8xf32>
    %35 = vector.shape_cast %31 : vector<16x8xf32> to vector<1x16x8xf32>
    %36 = vector.shape_cast %32 : vector<16x8xf32> to vector<1x16x8xf32>
    %37 = vector.shape_cast %33 : vector<16x8xf32> to vector<1x16x8xf32>
    %38 = vector.shape_cast %34 : vector<16x8xf32> to vector<1x16x8xf32>
    %39 = tpu.concatenate %35, %36, %37, %38 in 0 : vector<1x16x8xf32>, vector<1x16x8xf32>, vector<1x16x8xf32>, vector<1x16x8xf32> -> vector<4x16x8xf32>
    %40 = vector.extract_strided_slice %21 {offsets = [0, 32], sizes = [16, 8], strides = [1, 1]} : vector<16x64xf32> to vector<16x8xf32>
    %41 = vector.extract_strided_slice %21 {offsets = [0, 40], sizes = [16, 8], strides = [1, 1]} : vector<16x64xf32> to vector<16x8xf32>
    %42 = vector.extract_strided_slice %21 {offsets = [0, 48], sizes = [16, 8], strides = [1, 1]} : vector<16x64xf32> to vector<16x8xf32>
    %43 = vector.extract_strided_slice %21 {offsets = [0, 56], sizes = [16, 8], strides = [1, 1]} : vector<16x64xf32> to vector<16x8xf32>
    %44 = vector.shape_cast %40 : vector<16x8xf32> to vector<1x16x8xf32>
    %45 = vector.shape_cast %41 : vector<16x8xf32> to vector<1x16x8xf32>
    %46 = vector.shape_cast %42 : vector<16x8xf32> to vector<1x16x8xf32>
    %47 = vector.shape_cast %43 : vector<16x8xf32> to vector<1x16x8xf32>
    %48 = tpu.concatenate %44, %45, %46, %47 in 0 : vector<1x16x8xf32>, vector<1x16x8xf32>, vector<1x16x8xf32>, vector<1x16x8xf32> -> vector<4x16x8xf32>
    "tpu.trace_start"() <{level = 10 : i32, message = "hqd,hkd->hqk"}> : () -> ()
    %cst_19 = arith.constant dense<0.000000e+00> : vector<4x8x16xf32>
    %49 = tpu.matmul %30, %39, %cst_19 {dimension_numbers = #tpu.dot_dimension_numbers<[2], [2], [1], [1], [0, 0, 0, 1, 1, 1], [0], [0]>} : vector<4x8x8xf32>, vector<4x16x8xf32>, vector<4x8x16xf32> -> vector<4x8x16xf32>
    "tpu.trace_stop"() : () -> ()
    %cst_20 = arith.constant dense<0xFF800000> : vector<4x8xf32>
    %50 = vector.multi_reduction <maximumf>, %49, %cst_20 [2] : vector<4x8x16xf32> to vector<4x8xf32>
    %51 = vector.shape_cast %50 : vector<4x8xf32> to vector<4x8x1xf32>
    %52 = vector.broadcast %51 : vector<4x8x1xf32> to vector<4x8x16xf32>
    %53 = arith.subf %49, %52 : vector<4x8x16xf32>
    %54 = math.exp %53 : vector<4x8x16xf32>
    %cst_21 = arith.constant dense<0.000000e+00> : vector<4x8xf32>
    %55 = vector.multi_reduction <add>, %54, %cst_21 [2] : vector<4x8x16xf32> to vector<4x8xf32>
    %56 = vector.shape_cast %55 : vector<4x8xf32> to vector<4x8x1xf32>
    %57 = tpu.reciprocal %56 {approx = true} : vector<4x8x1xf32> -> vector<4x8x1xf32>
    %58 = vector.broadcast %57 : vector<4x8x1xf32> to vector<4x8x16xf32>
    %59 = arith.mulf %54, %58 : vector<4x8x16xf32>
    "tpu.trace_start"() <{level = 10 : i32, message = "hqk,hkd->hqd"}> : () -> ()
    %cst_22 = arith.constant dense<0.000000e+00> : vector<4x8x8xf32>
    %60 = tpu.matmul %59, %48, %cst_22 {dimension_numbers = #tpu.dot_dimension_numbers<[2], [1], [1], [2], [0, 0, 0, 1, 1, 2], [0], [0]>} : vector<4x8x16xf32>, vector<4x16x8xf32>, vector<4x8x8xf32> -> vector<4x8x8xf32>
    "tpu.trace_stop"() : () -> ()
    %61 = vector.extract_strided_slice %60 {offsets = [0, 0, 0], sizes = [1, 8, 8], strides = [1, 1, 1]} : vector<4x8x8xf32> to vector<1x8x8xf32>
    %62 = vector.shape_cast %61 : vector<1x8x8xf32> to vector<8x8xf32>
    %63 = vector.extract_strided_slice %60 {offsets = [1, 0, 0], sizes = [1, 8, 8], strides = [1, 1, 1]} : vector<4x8x8xf32> to vector<1x8x8xf32>
    %64 = vector.shape_cast %63 : vector<1x8x8xf32> to vector<8x8xf32>
    %65 = vector.extract_strided_slice %60 {offsets = [2, 0, 0], sizes = [1, 8, 8], strides = [1, 1, 1]} : vector<4x8x8xf32> to vector<1x8x8xf32>
    %66 = vector.shape_cast %65 : vector<1x8x8xf32> to vector<8x8xf32>
    %67 = vector.extract_strided_slice %60 {offsets = [3, 0, 0], sizes = [1, 8, 8], strides = [1, 1, 1]} : vector<4x8x8xf32> to vector<1x8x8xf32>
    %68 = vector.shape_cast %67 : vector<1x8x8xf32> to vector<8x8xf32>
    %69 = tpu.concatenate %62, %64, %66, %68 in 1 : vector<8x8xf32>, vector<8x8xf32>, vector<8x8xf32>, vector<8x8xf32> -> vector<8x32xf32>
    %c0_23 = arith.constant 0 : index
    %c0_24 = arith.constant 0 : index
    %c0_25 = arith.constant 0 : index
    %70 = vector.load %arg14[%c0_23, %c0_24, %c0_25] : memref<1x32x32xf32, #tpu.memory_space<vmem>>, vector<1x32x32xf32>
    %71 = vector.shape_cast %70 : vector<1x32x32xf32> to vector<32x32xf32>
    %cst_26 = arith.constant dense<0.000000e+00> : vector<8x32xf32>
    %72 = tpu.matmul %69, %71, %cst_26 {dimension_numbers = #tpu.dot_dimension_numbers<[1], [0], [0], [1], [0, 0, 1, 1], [], []>} : vector<8x32xf32>, vector<32x32xf32>, vector<8x32xf32> -> vector<8x32xf32>
    %c0_27 = arith.constant 0 : index
    %c0_28 = arith.constant 0 : index
    %c0_29 = arith.constant 0 : index
    %73 = vector.load %arg19[%c0_27, %c0_28, %c0_29] : memref<1x1x32xf32, #tpu.memory_space<vmem>>, vector<1x1x32xf32>
    %74 = vector.shape_cast %73 : vector<1x1x32xf32> to vector<1x32xf32>
    %75 = vector.broadcast %74 : vector<1x32xf32> to vector<8x32xf32>
    %76 = arith.addf %72, %75 : vector<8x32xf32>
    %77 = arith.addf %76, %3 : vector<8x32xf32>
    %c0_30 = arith.constant 0 : index
    %c0_31 = arith.constant 0 : index
    %c0_32 = arith.constant 0 : index
    %78 = vector.load %arg20[%c0_30, %c0_31, %c0_32] : memref<1x1x32xf32, #tpu.memory_space<vmem>>, vector<1x1x32xf32>
    %79 = vector.shape_cast %78 : vector<1x1x32xf32> to vector<1x32xf32>
    %c0_33 = arith.constant 0 : index
    %c0_34 = arith.constant 0 : index
    %c0_35 = arith.constant 0 : index
    %80 = vector.load %arg21[%c0_33, %c0_34, %c0_35] : memref<1x1x32xf32, #tpu.memory_space<vmem>>, vector<1x1x32xf32>
    %81 = vector.shape_cast %80 : vector<1x1x32xf32> to vector<1x32xf32>
    %cst_36 = arith.constant dense<0.000000e+00> : vector<8xf32>
    %82 = vector.multi_reduction <add>, %77, %cst_36 [1] : vector<8x32xf32> to vector<8xf32>
    %83 = vector.shape_cast %82 : vector<8xf32> to vector<8x1xf32>
    %cst_37 = arith.constant 3.200000e+01 : f32
    %84 = vector.broadcast %cst_37 : f32 to vector<8x1xf32>
    %85 = arith.divf %83, %84 : vector<8x1xf32>
    %86 = vector.broadcast %85 : vector<8x1xf32> to vector<8x32xf32>
    %87 = arith.subf %77, %86 : vector<8x32xf32>
    %88 = arith.mulf %87, %87 : vector<8x32xf32>
    %cst_38 = arith.constant dense<0.000000e+00> : vector<8xf32>
    %89 = vector.multi_reduction <add>, %88, %cst_38 [1] : vector<8x32xf32> to vector<8xf32>
    %90 = vector.shape_cast %89 : vector<8xf32> to vector<8x1xf32>
    %cst_39 = arith.constant 3.200000e+01 : f32
    %91 = vector.broadcast %cst_39 : f32 to vector<8x1xf32>
    %92 = arith.divf %90, %91 : vector<8x1xf32>
    %93 = vector.broadcast %85 : vector<8x1xf32> to vector<8x32xf32>
    %94 = arith.subf %77, %93 : vector<8x32xf32>
    %cst_40 = arith.constant 9.99999997E-7 : f32
    %95 = vector.broadcast %cst_40 : f32 to vector<8x1xf32>
    %96 = arith.addf %92, %95 : vector<8x1xf32>
    %97 = math.rsqrt %96 : vector<8x1xf32>
    %98 = vector.broadcast %97 : vector<8x1xf32> to vector<8x32xf32>
    %99 = arith.mulf %94, %98 : vector<8x32xf32>
    %100 = vector.broadcast %79 : vector<1x32xf32> to vector<8x32xf32>
    %101 = arith.mulf %99, %100 : vector<8x32xf32>
    %102 = vector.broadcast %81 : vector<1x32xf32> to vector<8x32xf32>
    %103 = arith.addf %101, %102 : vector<8x32xf32>
    %c0_41 = arith.constant 0 : index
    %c0_42 = arith.constant 0 : index
    %c0_43 = arith.constant 0 : index
    %104 = vector.load %arg15[%c0_41, %c0_42, %c0_43] : memref<1x32x64xf32, #tpu.memory_space<vmem>>, vector<1x32x64xf32>
    %105 = vector.shape_cast %104 : vector<1x32x64xf32> to vector<32x64xf32>
    %cst_44 = arith.constant dense<0.000000e+00> : vector<8x64xf32>
    %106 = tpu.matmul %103, %105, %cst_44 {dimension_numbers = #tpu.dot_dimension_numbers<[1], [0], [0], [1], [0, 0, 1, 1], [], []>} : vector<8x32xf32>, vector<32x64xf32>, vector<8x64xf32> -> vector<8x64xf32>
    %c0_45 = arith.constant 0 : index
    %c0_46 = arith.constant 0 : index
    %c0_47 = arith.constant 0 : index
    %107 = vector.load %arg22[%c0_45, %c0_46, %c0_47] : memref<1x1x64xf32, #tpu.memory_space<vmem>>, vector<1x1x64xf32>
    %108 = vector.shape_cast %107 : vector<1x1x64xf32> to vector<1x64xf32>
    %109 = vector.broadcast %108 : vector<1x64xf32> to vector<8x64xf32>
    %110 = arith.addf %106, %109 : vector<8x64xf32>
    %cst_48 = arith.constant 0.000000e+00 : f32
    %111 = vector.broadcast %cst_48 : f32 to vector<8x64xf32>
    %112 = arith.maximumf %110, %111 : vector<8x64xf32>
    %c0_49 = arith.constant 0 : index
    %c0_50 = arith.constant 0 : index
    %c0_51 = arith.constant 0 : index
    %113 = vector.load %arg16[%c0_49, %c0_50, %c0_51] : memref<1x64x32xf32, #tpu.memory_space<vmem>>, vector<1x64x32xf32>
    %114 = vector.shape_cast %113 : vector<1x64x32xf32> to vector<64x32xf32>
    %cst_52 = arith.constant dense<0.000000e+00> : vector<8x32xf32>
    %115 = tpu.matmul %112, %114, %cst_52 {dimension_numbers = #tpu.dot_dimension_numbers<[1], [0], [0], [1], [0, 0, 1, 1], [], []>} : vector<8x64xf32>, vector<64x32xf32>, vector<8x32xf32> -> vector<8x32xf32>
    %c0_53 = arith.constant 0 : index
    %c0_54 = arith.constant 0 : index
    %c0_55 = arith.constant 0 : index
    %116 = vector.load %arg23[%c0_53, %c0_54, %c0_55] : memref<1x1x32xf32, #tpu.memory_space<vmem>>, vector<1x1x32xf32>
    %117 = vector.shape_cast %116 : vector<1x1x32xf32> to vector<1x32xf32>
    %118 = vector.broadcast %117 : vector<1x32xf32> to vector<8x32xf32>
    %119 = arith.addf %115, %118 : vector<8x32xf32>
    %120 = arith.addf %119, %103 : vector<8x32xf32>
    %c0_56 = arith.constant 0 : index
    %c0_57 = arith.constant 0 : index
    %c0_58 = arith.constant 0 : index
    %121 = vector.load %arg24[%c0_56, %c0_57, %c0_58] : memref<1x1x32xf32, #tpu.memory_space<vmem>>, vector<1x1x32xf32>
    %122 = vector.shape_cast %121 : vector<1x1x32xf32> to vector<1x32xf32>
    %c0_59 = arith.constant 0 : index
    %c0_60 = arith.constant 0 : index
    %c0_61 = arith.constant 0 : index
    %123 = vector.load %arg25[%c0_59, %c0_60, %c0_61] : memref<1x1x32xf32, #tpu.memory_space<vmem>>, vector<1x1x32xf32>
    %124 = vector.shape_cast %123 : vector<1x1x32xf32> to vector<1x32xf32>
    %cst_62 = arith.constant dense<0.000000e+00> : vector<8xf32>
    %125 = vector.multi_reduction <add>, %120, %cst_62 [1] : vector<8x32xf32> to vector<8xf32>
    %126 = vector.shape_cast %125 : vector<8xf32> to vector<8x1xf32>
    %cst_63 = arith.constant 3.200000e+01 : f32
    %127 = vector.broadcast %cst_63 : f32 to vector<8x1xf32>
    %128 = arith.divf %126, %127 : vector<8x1xf32>
    %129 = vector.broadcast %128 : vector<8x1xf32> to vector<8x32xf32>
    %130 = arith.subf %120, %129 : vector<8x32xf32>
    %131 = arith.mulf %130, %130 : vector<8x32xf32>
    %cst_64 = arith.constant dense<0.000000e+00> : vector<8xf32>
    %132 = vector.multi_reduction <add>, %131, %cst_64 [1] : vector<8x32xf32> to vector<8xf32>
    %133 = vector.shape_cast %132 : vector<8xf32> to vector<8x1xf32>
    %cst_65 = arith.constant 3.200000e+01 : f32
    %134 = vector.broadcast %cst_65 : f32 to vector<8x1xf32>
    %135 = arith.divf %133, %134 : vector<8x1xf32>
    %136 = vector.broadcast %128 : vector<8x1xf32> to vector<8x32xf32>
    %137 = arith.subf %120, %136 : vector<8x32xf32>
    %cst_66 = arith.constant 9.99999997E-7 : f32
    %138 = vector.broadcast %cst_66 : f32 to vector<8x1xf32>
    %139 = arith.addf %135, %138 : vector<8x1xf32>
    %140 = math.rsqrt %139 : vector<8x1xf32>
    %141 = vector.broadcast %140 : vector<8x1xf32> to vector<8x32xf32>
    %142 = arith.mulf %137, %141 : vector<8x32xf32>
    %143 = vector.broadcast %122 : vector<1x32xf32> to vector<8x32xf32>
    %144 = arith.mulf %142, %143 : vector<8x32xf32>
    %145 = vector.broadcast %124 : vector<1x32xf32> to vector<8x32xf32>
    %146 = arith.addf %144, %145 : vector<8x32xf32>
    %c0_67 = arith.constant 0 : index
    %c0_68 = arith.constant 0 : index
    %147 = vector.load %arg27[%c0_67, %c0_68] : memref<8x32xf32, #tpu.memory_space<vmem>>, vector<8x32xf32>
    tpu.vector_store %arg27[%c0_67, %c0_68], %146 {strides = array<i32>} : memref<8x32xf32, #tpu.memory_space<vmem>>, vector<8x32xf32>,
    %c1_i32 = arith.constant 1 : i32
    %148 = arith.cmpi eq, %arg1, %c1_i32 : i32
    %149 = arith.extui %148 : i1 to i32
    %c0_i32_69 = arith.constant 0 : i32
    %150 = arith.cmpi ne, %149, %c0_i32_69 : i32
    scf.if %150 {
      %c0_70 = arith.constant 0 : index
      %c0_71 = arith.constant 0 : index
      %151 = vector.load %arg10[%c0_70, %c0_71] : memref<1x32xf32, #tpu.memory_space<vmem>>, vector<1x32xf32>
      %c0_72 = arith.constant 0 : index
      %c0_73 = arith.constant 0 : index
      %152 = vector.load %arg11[%c0_72, %c0_73] : memref<1x32xf32, #tpu.memory_space<vmem>>, vector<1x32xf32>
      %cst_74 = arith.constant dense<0.000000e+00> : vector<8xf32>
      %153 = vector.multi_reduction <add>, %146, %cst_74 [1] : vector<8x32xf32> to vector<8xf32>
      %154 = vector.shape_cast %153 : vector<8xf32> to vector<8x1xf32>
      %cst_75 = arith.constant 3.200000e+01 : f32
      %155 = vector.broadcast %cst_75 : f32 to vector<8x1xf32>
      %156 = arith.divf %154, %155 : vector<8x1xf32>
      %157 = vector.broadcast %156 : vector<8x1xf32> to vector<8x32xf32>
      %158 = arith.subf %146, %157 : vector<8x32xf32>
      %159 = arith.mulf %158, %158 : vector<8x32xf32>
      %cst_76 = arith.constant dense<0.000000e+00> : vector<8xf32>
      %160 = vector.multi_reduction <add>, %159, %cst_76 [1] : vector<8x32xf32> to vector<8xf32>
      %161 = vector.shape_cast %160 : vector<8xf32> to vector<8x1xf32>
      %cst_77 = arith.constant 3.200000e+01 : f32
      %162 = vector.broadcast %cst_77 : f32 to vector<8x1xf32>
      %163 = arith.divf %161, %162 : vector<8x1xf32>
      %164 = vector.broadcast %156 : vector<8x1xf32> to vector<8x32xf32>
      %165 = arith.subf %146, %164 : vector<8x32xf32>
      %cst_78 = arith.constant 9.99999997E-7 : f32
      %166 = vector.broadcast %cst_78 : f32 to vector<8x1xf32>
      %167 = arith.addf %163, %166 : vector<8x1xf32>
      %168 = math.rsqrt %167 : vector<8x1xf32>
      %169 = vector.broadcast %168 : vector<8x1xf32> to vector<8x32xf32>
      %170 = arith.mulf %165, %169 : vector<8x32xf32>
      %171 = vector.broadcast %151 : vector<1x32xf32> to vector<8x32xf32>
      %172 = arith.mulf %170, %171 : vector<8x32xf32>
      %173 = vector.broadcast %152 : vector<1x32xf32> to vector<8x32xf32>
      %174 = arith.addf %172, %173 : vector<8x32xf32>
      %c0_79 = arith.constant 0 : index
      %c0_80 = arith.constant 0 : index
      %c0_81 = arith.constant 0 : index
      %175 = vector.load %arg26[%c0_79, %c0_80, %c0_81] : memref<1x8x32xf32, #tpu.memory_space<vmem>>, vector<1x8x32xf32>
      %176 = vector.shape_cast %175 : vector<1x8x32xf32> to vector<8x32xf32>
      %177 = vector.shape_cast %174 : vector<8x32xf32> to vector<1x8x32xf32>
      tpu.vector_store %arg26[%c0_79, %c0_80, %c0_81], %177 {strides = array<i32>} : memref<1x8x32xf32, #tpu.memory_space<vmem>>, vector<1x8x32xf32>,
    } else {
    }
    return
  }
  func.func @transform_0(%arg0: i32, %arg1: i32) -> (i32, i32, i32) {
    %c0_i32 = arith.constant 0 : i32
    %c0_i32_0 = arith.constant 0 : i32
    %c0_i32_1 = arith.constant 0 : i32
    return %arg0, %c0_i32, %c0_i32_0 : i32, i32, i32
  }
  func.func @transform_1(%arg0: i32, %arg1: i32) -> (i32, i32, i32) {
    %c0_i32 = arith.constant 0 : i32
    %c0_i32_0 = arith.constant 0 : i32
    %c0_i32_1 = arith.constant 0 : i32
    return %arg0, %c0_i32, %c0_i32_0 : i32, i32, i32
  }
  func.func @transform_2(%arg0: i32, %arg1: i32) -> (i32, i32) {
    %c0_i32 = arith.constant 0 : i32
    %c0_i32_0 = arith.constant 0 : i32
    %c0_i32_1 = arith.constant 0 : i32
    return %c0_i32, %c0_i32_0 : i32, i32
  }
  func.func @transform_3(%arg0: i32, %arg1: i32) -> (i32, i32) {
    %c0_i32 = arith.constant 0 : i32
    %c0_i32_0 = arith.constant 0 : i32
    %c0_i32_1 = arith.constant 0 : i32
    return %c0_i32, %c0_i32_0 : i32, i32
  }
  func.func @transform_4(%arg0: i32, %arg1: i32) -> (i32, i32) {
    %c0_i32 = arith.constant 0 : i32
    %c0_i32_0 = arith.constant 0 : i32
    %c0_i32_1 = arith.constant 0 : i32
    return %c0_i32, %c0_i32_0 : i32, i32
  }
  func.func @transform_5(%arg0: i32, %arg1: i32) -> (i32, i32) {
    %c0_i32 = arith.constant 0 : i32
    %c0_i32_0 = arith.constant 0 : i32
    %c0_i32_1 = arith.constant 0 : i32
    return %c0_i32, %c0_i32_0 : i32, i32
  }
  func.func @transform_6(%arg0: i32, %arg1: i32) -> (i32, i32) {
    %c0_i32 = arith.constant 0 : i32
    %c0_i32_0 = arith.constant 0 : i32
    %c0_i32_1 = arith.constant 0 : i32
    return %c0_i32, %c0_i32_0 : i32, i32
  }
  func.func @transform_7(%arg0: i32, %arg1: i32) -> (i32, i32) {
    %c0_i32 = arith.constant 0 : i32
    %c0_i32_0 = arith.constant 0 : i32
    %c0_i32_1 = arith.constant 0 : i32
    return %c0_i32, %c0_i32_0 : i32, i32
  }
  func.func @transform_8(%arg0: i32, %arg1: i32) -> (i32, i32) {
    %c0_i32 = arith.constant 0 : i32
    %c0_i32_0 = arith.constant 0 : i32
    %c0_i32_1 = arith.constant 0 : i32
    return %c0_i32, %c0_i32_0 : i32, i32
  }
  func.func @transform_9(%arg0: i32, %arg1: i32) -> (i32, i32) {
    %c0_i32 = arith.constant 0 : i32
    %c0_i32_0 = arith.constant 0 : i32
    %c0_i32_1 = arith.constant 0 : i32
    return %c0_i32, %c0_i32_0 : i32, i32
  }
  func.func @transform_10(%arg0: i32, %arg1: i32) -> (i32, i32, i32) {
    %c0_i32 = arith.constant 0 : i32
    %c0_i32_0 = arith.constant 0 : i32
    %c0_i32_1 = arith.constant 0 : i32
    return %arg1, %c0_i32, %c0_i32_0 : i32, i32, i32
  }
  func.func @transform_11(%arg0: i32, %arg1: i32) -> (i32, i32, i32) {
    %c0_i32 = arith.constant 0 : i32
    %c0_i32_0 = arith.constant 0 : i32
    %c0_i32_1 = arith.constant 0 : i32
    return %arg1, %c0_i32, %c0_i32_0 : i32, i32, i32
  }
  func.func @transform_12(%arg0: i32, %arg1: i32) -> (i32, i32, i32) {
    %c0_i32 = arith.constant 0 : i32
    %c0_i32_0 = arith.constant 0 : i32
    %c0_i32_1 = arith.constant 0 : i32
    return %arg1, %c0_i32, %c0_i32_0 : i32, i32, i32
  }
  func.func @transform_13(%arg0: i32, %arg1: i32) -> (i32, i32, i32) {
    %c0_i32 = arith.constant 0 : i32
    %c0_i32_0 = arith.constant 0 : i32
    %c0_i32_1 = arith.constant 0 : i32
    return %arg1, %c0_i32, %c0_i32_0 : i32, i32, i32
  }
  func.func @transform_14(%arg0: i32, %arg1: i32) -> (i32, i32, i32) {
    %c0_i32 = arith.constant 0 : i32
    %c0_i32_0 = arith.constant 0 : i32
    %c0_i32_1 = arith.constant 0 : i32
    return %arg1, %c0_i32, %c0_i32_0 : i32, i32, i32
  }
  func.func @transform_15(%arg0: i32, %arg1: i32) -> (i32, i32, i32) {
    %c0_i32 = arith.constant 0 : i32
    %c0_i32_0 = arith.constant 0 : i32
    %c0_i32_1 = arith.constant 0 : i32
    return %arg1, %c0_i32, %c0_i32_0 : i32, i32, i32
  }
  func.func @transform_16(%arg0: i32, %arg1: i32) -> (i32, i32, i32) {
    %c0_i32 = arith.constant 0 : i32
    %c0_i32_0 = arith.constant 0 : i32
    %c0_i32_1 = arith.constant 0 : i32
    return %arg1, %c0_i32, %c0_i32_0 : i32, i32, i32
  }
  func.func @transform_17(%arg0: i32, %arg1: i32) -> (i32, i32, i32) {
    %c0_i32 = arith.constant 0 : i32
    %c0_i32_0 = arith.constant 0 : i32
    %c0_i32_1 = arith.constant 0 : i32
    return %arg1, %c0_i32, %c0_i32_0 : i32, i32, i32
  }
  func.func @transform_18(%arg0: i32, %arg1: i32) -> (i32, i32, i32) {
    %c0_i32 = arith.constant 0 : i32
    %c0_i32_0 = arith.constant 0 : i32
    %c0_i32_1 = arith.constant 0 : i32
    return %arg1, %c0_i32, %c0_i32_0 : i32, i32, i32
  }
  func.func @transform_19(%arg0: i32, %arg1: i32) -> (i32, i32, i32) {
    %c0_i32 = arith.constant 0 : i32
    %c0_i32_0 = arith.constant 0 : i32
    %c0_i32_1 = arith.constant 0 : i32
    return %arg1, %c0_i32, %c0_i32_0 : i32, i32, i32
  }
  func.func @transform_20(%arg0: i32, %arg1: i32) -> (i32, i32, i32) {
    %c0_i32 = arith.constant 0 : i32
    %c0_i32_0 = arith.constant 0 : i32
    %c0_i32_1 = arith.constant 0 : i32
    return %arg1, %c0_i32, %c0_i32_0 : i32, i32, i32
  }
  func.func @transform_21(%arg0: i32, %arg1: i32) -> (i32, i32, i32) {
    %c0_i32 = arith.constant 0 : i32
    %c0_i32_0 = arith.constant 0 : i32
    %c0_i32_1 = arith.constant 0 : i32
    return %arg1, %c0_i32, %c0_i32_0 : i32, i32, i32
  }
  func.func @transform_22(%arg0: i32, %arg1: i32) -> (i32, i32, i32) {
    %c0_i32 = arith.constant 0 : i32
    %c0_i32_0 = arith.constant 0 : i32
    %c0_i32_1 = arith.constant 0 : i32
    return %arg1, %c0_i32, %c0_i32_0 : i32, i32, i32
  }
  func.func @transform_23(%arg0: i32, %arg1: i32) -> (i32, i32, i32) {
    %c0_i32 = arith.constant 0 : i32
    %c0_i32_0 = arith.constant 0 : i32
    %c0_i32_1 = arith.constant 0 : i32
    return %arg1, %c0_i32, %c0_i32_0 : i32, i32, i32
  }
  func.func @transform_24(%arg0: i32, %arg1: i32) -> (i32, i32, i32) {
    %c0_i32 = arith.constant 0 : i32
    %c0_i32_0 = arith.constant 0 : i32
    %c0_i32_1 = arith.constant 0 : i32
    return %arg0, %c0_i32, %c0_i32_0 : i32, i32, i32
  }
}

</mosaic_0001>

<bundles_post_ra>
// kernel: tpu_custom_call.1
= control target key start
LH: loop header
LB: loop body
LE: loop exit
PB: predicated region body
PF: predicated region fallthrough
CT: control target
= control target key end

     0   :  { %s4363_s0 = inlined_call_operand.vmem [shape: f32[2,8,4], index: 0, kind: input, shape index: {}]   ;;  %s4364_s1 = inlined_call_operand.hbm [shape: f32[2,16,32], index: 1, kind: input, shape index: {}]   ;;  %s4365_s2 = inlined_call_operand.hbm [shape: f32[4,64], index: 2, kind: input, shape index: {}]   ;;  %s4366_s3 = inlined_call_operand.vmem [shape: f32[64,32], index: 3, kind: input, shape index: {}]   ;;  %s4367_s4 = inlined_call_operand.hbm [shape: f32[1,64], index: 4, kind: input, shape index: {}]   ;;  %s4368_s5 = inlined_call_operand.hbm [shape: f32[1,32], index: 5, kind: input, shape index: {}]   ;;  %s4369_s6 = inlined_call_operand.hbm [shape: f32[1,32], index: 6, kind: input, shape index: {}]   ;;  %s4370_s7 = inlined_call_operand.vmem [shape: f32[1,32], index: 7, kind: input, shape index: {}]   ;;  %s4371_s8 = inlined_call_operand.vmem [shape: f32[1,32], index: 8, kind: input, shape index: {}]   ;;  %s4372_s9 = inlined_call_operand.vmem [shape: f32[1,32], index: 9, kind: input, shape index: {}]   ;;  %s4373_s10 = inlined_call_operand.vmem [shape: f32[2,32,32], index: 10, kind: input, shape index: {}]   ;;  %s4374_s11 = inlined_call_operand.vmem [shape: f32[2,32,64], index: 11, kind: input, shape index: {}]   ;;  %s4375_s12 = inlined_call_operand.vmem [shape: f32[2,32,32], index: 12, kind: input, shape index: {}]   ;;  %s4376_s13 = inlined_call_operand.vmem [shape: f32[2,32,64], index: 13, kind: input, shape index: {}]   ;;  %s4377_s14 = inlined_call_operand.vmem [shape: f32[2,64,32], index: 14, kind: input, shape index: {}]   ;;  %s4378_s15 = inlined_call_operand.vmem [shape: f32[2,1,32], index: 15, kind: input, shape index: {}]   ;;  %s4379_s16 = inlined_call_operand.vmem [shape: f32[2,1,64], index: 16, kind: input, shape index: {}]   ;;  %s4380_s17 = inlined_call_operand.vmem [shape: f32[2,1,32], index: 17, kind: input, shape index: {}]   ;;  %s4381_s18 = inlined_call_operand.vmem [shape: f32[2,1,32], index: 18, kind: input, shape index: {}]   ;;  %s4382_s19 = inlined_call_operand.vmem [shape: f32[2,1,32], index: 19, kind: input, shape index: {}]   ;;  %s4383_s20 = inlined_call_operand.vmem [shape: f32[2,1,64], index: 20, kind: input, shape index: {}]   ;;  %s4384_s21 = inlined_call_operand.vmem [shape: f32[2,1,32], index: 21, kind: input, shape index: {}]   ;;  %s4385_s22 = inlined_call_operand.vmem [shape: f32[2,1,32], index: 22, kind: input, shape index: {}]   ;;  %s4386_s23 = inlined_call_operand.vmem [shape: f32[2,1,32], index: 23, kind: input, shape index: {}]   ;;  %s4387_s24 = inlined_call_operand.hbm [shape: f32[2,8,32], index: 24, kind: output, shape index: {}]  }
   0x1   :  { %4418 = sst [smem:[#allocation31_spill]] %s4363_s0 }
   0x2   :  { %4419 = sst [smem:[#allocation32_spill]] %s4364_s1 }
   0x3   :  { %4420 = sst [smem:[#allocation33_spill]] %s4365_s2 }
   0x4   :  { %4421 = sst [smem:[#allocation34_spill]] %s4366_s3 }
   0x5   :  { %4422 = sst [smem:[#allocation35_spill]] %s4367_s4 }
   0x6   :  { %4423 = sst [smem:[#allocation36_spill]] %s4368_s5 }
   0x7   :  { %4424 = sst [smem:[#allocation37_spill]] %s4369_s6 }
   0x8   :  { %4425 = sst [smem:[#allocation38_spill]] %s4370_s7 }
   0x9   :  { %4426 = sst [smem:[#allocation39_spill]] %s4371_s8 }
   0xa   :  { %4427 = sst [smem:[#allocation40_spill]] %s4372_s9 }
   0xb   :  { %4428 = sst [smem:[#allocation41_spill]] %s4373_s10 }
   0xc   :  { %4429 = sst [smem:[#allocation42_spill]] %s4374_s11 }
   0xd   :  { %4430 = sst [smem:[#allocation43_spill]] %s4375_s12 }
   0xe   :  { %4431 = sst [smem:[#allocation44_spill]] %s4376_s13 }
   0xf   :  { %4432 = sst [smem:[#allocation45_spill]] %s4377_s14 }
  0x10   :  { %4433 = sst [smem:[#allocation46_spill]] %s4378_s15 }
  0x11   :  { %4434 = sst [smem:[#allocation47_spill]] %s4379_s16 }
  0x12   :  { %4435 = sst [smem:[#allocation48_spill]] %s4380_s17 }
  0x13   :  { %4436 = sst [smem:[#allocation49_spill]] %s4381_s18 }
  0x14   :  { %4437 = sst [smem:[#allocation50_spill]] %s4382_s19 }
  0x15   :  { %4438 = sst [smem:[#allocation51_spill]] %s4383_s20 }
  0x16   :  { %4439 = sst [smem:[#allocation52_spill]] %s4384_s21 }
  0x17   :  { %4440 = sst [smem:[#allocation53_spill]] %s4385_s22 }
  0x18   :  { %4441 = sst [smem:[#allocation54_spill]] %s4386_s23 }
  0x19   :  { %4442 = sst [smem:[#allocation55_spill]] %s4387_s24 }
  0x1a   :  { %29 = vsyncpa [#allocation4], 0 }
  0x1b   :  { %31 = vsyncpa [#allocation4 + $0x1], 0 }
  0x1c   :  { %32 = vsyncpa [#allocation7], 0 }
  0x1d   :  { %33 = vsyncpa [#allocation10], 0 }
  0x1e   :  { %34 = vsyncpa [#allocation5], 0 }
  0x1f   :  { %36 = vsyncpa [#allocation5 + $0x1], 0  ;;  %s3754_s5 = smov 0   ;;  %s3756_s26 = smov 0  }
  0x20   :  { %s3758_s27 = smov 0   ;;  %s3760_s28 = smov 0  }
  0x21   :  { %s3762_s6 = smov 0   ;;  %s3764_s2 = smov 0  }
  0x22   :  { %s3766_s29 = smov 0   ;;  %s3768_s0 = smov 0  }
  0x23 LB: > { %4443 = sst [smem:[#allocation17_spill]] %s3578_s5  ;;  %s2798_s7 = sadd.s32 4294967295, %s3606_s0   ;;  %s3606_s0 = sphi %s3768_s0, %s42_s0   ;;  %s3602_s29 = sphi %s3766_s29, %s4525_s29   ;;  %s3598_s2 = sphi %s3764_s2, %s4524_s2   ;;  %s3594_s6 = sphi %s3762_s6, %s4523_s6   ;;  %s3590_s28 = sphi %s3760_s28, %s4522_s28   ;;  %s3586_s27 = sphi %s3758_s27, %s4521_s27   ;;  %s3582_s26 = sphi %s3756_s26, %s4520_s26   ;;  %s3578_s5 = sphi %s3754_s5, %s4519_s5  }
  0x24   : > { %4444 = sst [smem:[#allocation18_spill]] %s3582_s26  ;;  %s2799_s30 = sadd.s32 4294967294, %s3606_s0  }
  0x25   : > { %4445 = sst [smem:[#allocation19_spill]] %s3586_s27  ;;  %p100_p0 = scmp.ne.s32.totalorder %s3582_s26, %s3578_s5 }
  0x26   : > { %4446 = sst [smem:[#allocation20_spill]] %s3594_s6  ;;  %p3798_p1 = scmp.eq.s32.totalorder %s2798_s7, 0 }
  0x27   : > { %4447 = sst [smem:[#allocation21_spill]] %s3598_s2  ;;  %p3802_p2 = scmp.eq.s32.totalorder %s2798_s7, 3 }
  0x28   : > { %4448 = sst [smem:[#allocation22_spill]] %s3602_s29  ;;  %p662_p3 = scmp.eq.s32.totalorder %s2799_s30, 3 }
  0x29   : > { %4449 = sst [smem:[#allocation23_spill]] %s3606_s0  ;;  %p3808_p4 = por %p3798_p1, %p100_p0 }
  0x2a   : > { %s4450_s3 = scalar_select %p3798_p1, 1, 0 }
  0x2b   : > { %s4451_s25 = scalar_select %p3802_p2, 1, 0 }
  0x2c   : > { %s4452_s8 = scalar_select %p3808_p4, 1, 0 }
  0x2d   : > { %p2800_p5 = scmp.ge.s32.totalorder %s3606_s0, 1  ;;  %p3813_p6 = por %p662_p3, %p100_p0 }
  0x2e   : > { %p669_p7 = scmp.lt.s32.totalorder %s3606_s0, 5  ;;  %s3608_s7 = smov [#allocation6]  }
  0x2f   : > { %s4453_s4 = scalar_select %p3813_p6, 1, 0 }
  0x30   : > { %p3818_p8 = pnand %p2800_p5, %p669_p7  ;;  %s682_s5 = sshll.u32 %s3608_s7, 4  ;;  %s683_s5 = int_to_ptr.vmem [resolvable:$true] %s682_s5 }
  0x31   : > { %4454 = sst [smem:[#allocation24_spill]] %s4453_s4  ;;  %s3609_s30 = smov [#allocation9]  }
  0x32   : > { %s4455_s1 = scalar_select %p3818_p8, 1, 0 }
  0x33   : > { %p3185_p9 = pneg %p3818_p8  ;;  %s707_s24 = sshll.u32 %s3609_s30, 4  ;;  %s3830_s24 = int_to_ptr.vmem [resolvable:$true] %s707_s24 }
  0x34   : > { %s3610_s4 = smov [#allocation8]   ;;  %s4457_s7 = sld [smem:[#allocation33_spill]] }
  0x35   : > { %p3826_p10 = pnand %p3185_p9, %p3798_p1  ;;  %s696_s23 = sshll.u32 %s3610_s4, 4  ;;  %s3832_s23 = int_to_ptr.vmem [resolvable:$true] %s696_s23 }
  0x37   : > { %p3842_p12 = pneg %p3826_p10 }
  0x3a   : > { %s3358_s20 = scalar_lea.hbm %s4457_s7, 64 }
  0x3b   : > { %p3359_p11 = scmp.ne.s32.totalorder %s4457_s7, %s3358_s20  ;;  %p3365_p3 = scmp.lt.u32.totalorder %s3358_s20, %s4457_s7 }
  0x3d   : > { %p3361_p13 = pnand %p3842_p12, %p3359_p11 }
  0x3f   : > { %p3362_p0 = pneg %p3361_p13 }
  0x41   : > { %p3367_p5 = pnand %p3365_p3, %p3362_p0 }
  0x43   : > { %3370 = shalt.err (!%p3367_p5)
}
  0x44   : > { %s3371_s21 = scalar_lea.vmem %s683_s5, 64  ;;  %p3379_p1 = scmp.lt.s32.totalorder %s683_s5, %s683_s5 }
  0x45   : > { %p3372_p7 = scmp.ne.s32.totalorder %s683_s5, %s3371_s21  ;;  %p3380_p4 = scmp.lt.s32.totalorder %s3371_s21, %s3371_s21 }
  0x47   : > { %p3374_p9 = pnand %p3372_p7, %p3842_p12  ;;  %p3381_p8 = por %p3380_p4, %p3379_p1 }
  0x49   : > { %p3375_p6 = pneg %p3374_p9 }
  0x4b   : > { %p3382_p2 = pnand %p3381_p8, %p3375_p6 }
  0x4d   : > { %3385 = shalt.err (!%p3382_p2)
}
  0x4e   : > { %3188 = dma.hbm_to_vmem [thread:$0]  (!%p3826_p10), %s4457_s7, 64, %s683_s5, [#allocation7]  }
  0x4f   : > { %s4459_s22 = sld [smem:[#allocation36_spill]] }
  0x55   : > { %s3386_s4 = scalar_lea.hbm %s4459_s22, 16 }
  0x56   : > { %p3387_p11 = scmp.ne.s32.totalorder %s4459_s22, %s3386_s4  ;;  %p3393_p2 = scmp.lt.u32.totalorder %s3386_s4, %s4459_s22 }
  0x58   : > { %p3389_p13 = pnand %p3387_p11, %p3842_p12 }
  0x5a   : > { %p3390_p1 = pneg %p3389_p13 }
  0x5c   : > { %p3395_p4 = pnand %p3393_p2, %p3390_p1 }
  0x5e   : > { %3398 = shalt.err (!%p3395_p4)
}
  0x5f   : > { %s3399_s5 = scalar_lea.vmem %s3830_s24, 16  ;;  %s3406_s14 = scalar_lea.vmem %s3830_s24, 32 }
  0x60   : > { %p3400_p6 = scmp.ne.s32.totalorder %s3830_s24, %s3399_s5  ;;  %p3407_p3 = scmp.lt.s32.totalorder %s3830_s24, %s3830_s24 }
  0x61   : > { %p3408_p5 = scmp.lt.s32.totalorder %s3406_s14, %s3399_s5 }
  0x62   : > { %p3402_p8 = pnand %p3400_p6, %p3842_p12 }
  0x63   : > { %p3409_p7 = por %p3408_p5, %p3407_p3 }
  0x64   : > { %p3403_p0 = pneg %p3402_p8 }
  0x66   : > { %p3410_p9 = pnand %p3409_p7, %p3403_p0 }
  0x68   : > { %3413 = shalt.err (!%p3410_p9)
}
  0x69   : > { %3194 = dma.hbm_to_vmem [thread:$0]  (!%p3826_p10), %s4459_s22, 16, %s3830_s24, [#allocation10]  }
  0x6a   : > { %s4460_s17 = sld [smem:[#allocation35_spill]] }
  0x70   : > { %s3414_s20 = scalar_lea.hbm %s4460_s17, 16 }
  0x71   : > { %p3415_p11 = scmp.ne.s32.totalorder %s4460_s17, %s3414_s20  ;;  %p3421_p2 = scmp.lt.u32.totalorder %s3414_s20, %s4460_s17 }
  0x73   : > { %p3417_p13 = pnand %p3415_p11, %p3842_p12 }
  0x75   : > { %p3418_p1 = pneg %p3417_p13 }
  0x77   : > { %p3423_p4 = pnand %p3421_p2, %p3418_p1 }
  0x79   : > { %3426 = shalt.err (!%p3423_p4)
}
  0x7a   : > { %s3427_s24 = scalar_lea.vmem %s3832_s23, 16  ;;  %s3434_s15 = scalar_lea.vmem %s3832_s23, 32 }
  0x7b   : > { %p3428_p6 = scmp.ne.s32.totalorder %s3832_s23, %s3427_s24  ;;  %p3435_p3 = scmp.lt.s32.totalorder %s3832_s23, %s3832_s23 }
  0x7c   : > { %p3436_p5 = scmp.lt.s32.totalorder %s3434_s15, %s3427_s24 }
  0x7d   : > { %p3430_p8 = pnand %p3428_p6, %p3842_p12 }
  0x7e   : > { %p3437_p7 = por %p3436_p5, %p3435_p3 }
  0x7f   : > { %p3431_p0 = pneg %p3430_p8 }
  0x81   : > { %p3438_p9 = pnand %p3437_p7, %p3431_p0 }
  0x83   : > { %3441 = shalt.err (!%p3438_p9)
}
  0x84   : > { %3191 = dma.hbm_to_vmem [thread:$0]  (!%p3826_p10), %s4460_s17, 16, %s3832_s23, [#allocation7]  }
  0x85   : > { %s3611_s19 = smov [#allocation11]   ;;  %s4461_s5 = sld [smem:[#allocation37_spill]] }
  0x86   : > { %s718_s20 = sshll.u32 %s3611_s19, 4  ;;  %s719_s20 = int_to_ptr.vmem [resolvable:$true] %s718_s20 }
  0x8b   : > { %s4462_s14 = smov %s4461_s5  ;;  %s3442_s7 = scalar_lea.hbm %s4461_s5, 16 }
  0x8c   : > { %p3443_p11 = scmp.ne.s32.totalorder %s4462_s14, %s3442_s7  ;;  %p3449_p2 = scmp.lt.u32.totalorder %s3442_s7, %s4462_s14 }
  0x8e   : > { %p3445_p13 = pnand %p3443_p11, %p3842_p12 }
  0x90   : > { %p3446_p1 = pneg %p3445_p13 }
  0x92   : > { %p3451_p4 = pnand %p3449_p2, %p3446_p1 }
  0x94   : > { %3454 = shalt.err (!%p3451_p4)
}
  0x95   : > { %s3455_s23 = scalar_lea.vmem %s719_s20, 16  ;;  %s3462_s16 = scalar_lea.vmem %s719_s20, 32 }
  0x96   : > { %p3456_p6 = scmp.ne.s32.totalorder %s719_s20, %s3455_s23  ;;  %p3463_p3 = scmp.lt.s32.totalorder %s719_s20, %s719_s20 }
  0x97   : > { %p3464_p5 = scmp.lt.s32.totalorder %s3462_s16, %s3455_s23 }
  0x98   : > { %p3458_p8 = pnand %p3456_p6, %p3842_p12 }
  0x99   : > { %p3465_p7 = por %p3464_p5, %p3463_p3 }
  0x9a   : > { %p3459_p0 = pneg %p3458_p8 }
  0x9c   : > { %p3466_p9 = pnand %p3465_p7, %p3459_p0 }
  0x9e   : > { %3469 = shalt.err (!%p3466_p9)
}
  0x9f   : > { %3197 = dma.hbm_to_vmem [thread:$0]  (!%p3826_p10), %s4462_s14, 16, %s719_s20, [#allocation10]  }
  0xa0   : > { %s51_s13 = sadd.s32 1, %s3598_s2  ;;  %s54_s7 = sadd.s32 1, %s3602_s29 }
  0xa1   : > { %p52_p12 = scmp.ge.s32.totalorder %s51_s13, 2  ;;  %s87_s9 = sadd.s32 1, %s3586_s27 }
  0xa2   : > { %p94_p11 = scmp.ne.s32.totalorder %s3586_s27, %s3582_s26  ;;  %p95_p13 = scmp.eq.s32.totalorder %s3606_s0, 0 }
  0xa3   : > { %s4527_s13 = smov (%p52_p12, %s51_s13), 0  ;;  %s4529_s7 = smov (!%p52_p12, %s54_s7), %s3602_s29 }
  0xa4   : > { %4463 = sst [smem:[#allocation25_spill]] %s4527_s13  ;;  %p3933_p1 = por %p95_p13, %p94_p11 }
  0xa5   : > { %p4465_p2 = scmp.ne.s32.totalorder %s4451_s25, 0  ;;  %p56_p10 = scmp.ge.s32.totalorder %s4529_s7, 2 }
  0xa6   : > { %p3210_p6 = scmp.lt.s32.totalorder %s3606_s0, 4  ;;  %s745_s20 = sand.u32 1, %s3586_s27  }
  0xa7   : > { %p3939_p4 = por %p4465_p2, %p94_p11  ;;  %s2873_s4 = sshll.u32 %s3602_s29, 8 }
  0xa8   : > { %s4531_s7 = smov (%p56_p10, %s4529_s7), 0  ;;  %s2806_s21 = sshll.u32 %s745_s20, 4 }
  0xa9   : > { %s4466_s19 = scalar_select %p3939_p4, 1, 0 }
  0xaa   : > { %4468 = sst [smem:[#allocation27_spill]] %s4531_s7  ;;  %s84_s5 = ssub.s32 %s3602_s29, %s4531_s7 }
  0xab   : > { %4467 = sst [smem:[#allocation26_spill]] %s4466_s19  ;;  %p85_p8 = scmp.eq.s32.totalorder %s84_s5, 0 }
  0xac   : > { %s4469_s23 = sld [smem:[#allocation32_spill]]  ;;  %s749_s25 = scalar_lea.vmem [#allocation3], %s2806_s21 }
  0xad   : > { %s756_s22 = sshll.u32 %s749_s25, 4  ;;  %p3957_p0 = pnand %p3210_p6, %p3933_p1  ;;  %s3964_s22 = int_to_ptr.vmem [resolvable:$true] %s756_s22 }
  0xae   : > { %s3962_s14 = scalar_select %p85_p8, %s3586_s27, %s87_s9  }
  0xaf   : > { %s3966_s5 = scalar_lea.sflag [#allocation4], %s745_s20  ;;  %p3472_p5 = pneg %p3957_p0 }
  0xb0   : > { %4471 = sst [smem:[#allocation28_spill]] %s3962_s14 }
  0xb2   : > { %s3953_s16 = scalar_lea.hbm %s4469_s23, %s2873_s4  ;;  %s3475_s24 = scalar_lea.hbm %s4469_s23, 512 }
  0xb3   : > { %s3470_s4 = scalar_lea.hbm %s3953_s16, 256  ;;  %p3476_p12 = scmp.lt.u32.totalorder %s3953_s16, %s4469_s23 }
  0xb4   : > { %p3471_p3 = scmp.ne.s32.totalorder %s3953_s16, %s3470_s4  ;;  %p3477_p11 = scmp.lt.u32.totalorder %s3475_s24, %s3470_s4 }
  0xb5   : > { %p3479_p1 = scmp.lt.u32.totalorder %s3470_s4, %s3953_s16 }
  0xb6   : > { %p3473_p7 = pnand %p3472_p5, %p3471_p3  ;;  %p3478_p13 = por %p3477_p11, %p3476_p12 }
  0xb8   : > { %p3474_p9 = pneg %p3473_p7  ;;  %p3480_p2 = por %p3479_p1, %p3478_p13 }
  0xba   : > { %p3481_p10 = pnand %p3480_p2, %p3474_p9 }
  0xbc   : > { %3484 = shalt.err (!%p3481_p10)
}
  0xbd   : > { %s3485_s9 = scalar_lea.vmem %s3964_s22, 256  ;;  %s3612_s20 = smov [#allocation3]  }
  0xbe   : > { %p3486_p6 = scmp.ne.s32.totalorder %s3964_s22, %s3485_s9  ;;  %s3490_s30 = sshll.u32 %s3612_s20, 4  ;;  %s3491_s30 = int_to_ptr.vmem [resolvable:$false] %s3490_s30 }
  0xbf   : > { %s3492_s21 = scalar_lea.vmem %s3491_s30, 512  ;;  %p3493_p7 = scmp.lt.s32.totalorder %s3964_s22, %s3491_s30 }
  0xc0   : > { %p3488_p8 = pnand %p3486_p6, %p3472_p5  ;;  %p3494_p12 = scmp.lt.s32.totalorder %s3492_s21, %s3485_s9 }
  0xc2   : > { %p3489_p3 = pneg %p3488_p8  ;;  %p3495_p11 = por %p3494_p12, %p3493_p7 }
  0xc4   : > { %p3496_p13 = pnand %p3495_p11, %p3489_p3 }
  0xc6   : > { %3499 = shalt.err (!%p3496_p13)
}
  0xc7   : > { %s3613_s4 = smov 128   ;;  %s3614_s24 = smov 8  }
  0xc8   : > { %3201 = dma.hbm_to_vmem [thread:$0]  (!%p3957_p0), %s3953_s16, 256, %s3964_s22, %s3966_s5, %s3613_s4, %s3613_s4, %s3614_s24  }
  0xc9   : > { %p4472_p5 = scmp.ne.s32.totalorder %s4455_s1, 0 }
  0xcb   : > { %862 = sbr.rel (%p4472_p5) target bundleno = 3814 (0xee6), region = 116 }
  0xd2   : > { %s3997_s15 = sand.u32 1, %s3582_s26   ;;  %p4474_p9 = scmp.ne.s32.totalorder %s4452_s8, 0 }
  0xd3   : > { %4473 = sst [smem:[#allocation29_spill]] %s3997_s15  ;;  %s2810_s25 = sshll.u32 %s3997_s15, 4 }
  0xd4   : > { %s865_s9 = scalar_lea.sflag [#allocation4], %s3997_s15  ;;  %s4001_s20 = scalar_lea.vmem [#allocation3], %s2810_s25 }
  0xd5   : > { %3561 = dma.done.wait (%p4474_p9), %s865_s9, 256  }
  0xd6   : > { %3563 = vsyncadd (%p4474_p9), %s865_s9, 4294967040  ;;  %p4475_p0 = scmp.ne.s32.totalorder %s4450_s3, 0 }
  0xd8   : > { %3565 = dma.done.wait (%p4475_p0), [#allocation7], 80  }
  0xd9   : > { %3567 = vsyncadd (%p4475_p0), [#allocation7], 4294967216 }
  0xda   : > { %3569 = dma.done.wait (%p4475_p0), [#allocation10], 32  }
  0xdb   : > { %3571 = vsyncadd (%p4475_p0), [#allocation10], 4294967264  ;;  %s2815_s1 = sshll.u32 %s3997_s15, 3  ;;  %p1005_p1 = scmp.lt.s32.totalorder %s3594_s6, 1 }
  0xdc   : > { %p1009_p2 = scmp.lt.s32.totalorder %s3590_s28, 1  ;;  %s4476_s5 = sld [smem:[#allocation31_spill]] }
  0xdd   : > { %s1006_s8 = scalar_select %p1005_p1, %s3594_s6, 1 }
  0xde   : > { %s4020_s16 = scalar_select %p1009_p2, %s3590_s28, 1 }
  0xdf   : > { %s2816_s3 = sshll.u32 %s1006_s8, 3  ;;  %s4477_s10 = sld [smem:[#allocation41_spill]] }
  0xe0   : > { %s2874_s21 = sshll.u32 %s4020_s16, 5  ;;  %s4478_s11 = sld [smem:[#allocation42_spill]] }
  0xe1   : > { %s4479_s12 = sld [smem:[#allocation43_spill]]  ;;  %s2878_s29 = sshll.u32 %s4020_s16, 6 }
  0xe2   : > { %s1008_s30 = scalar_lea.vmem %s4476_s5, %s2816_s3  ;;  %s4480_s3 = sld [smem:[#allocation44_spill]] }
  0xe3   : > { %s4482_s17 = sld [smem:[#allocation45_spill]]  ;;  %s4487_s4 = sld [smem:[#allocation50_spill]] }
  0xe4   : > { %p2827_p10 = scmp.ne.s32.totalorder %s3590_s28, 0 }
  0xe5   : > { %s4029_s25 = scalar_lea.vmem %s4477_s10, %s2874_s21  ;;  %v1066_v0 = vld [vmem:[#allocation6] sm:$0xf] (!%p2827_p10)  ;;  %vm1078_vm0 = vcmask (!%p2827_p10), 1043456   ;;  %v1065_v1 = vld [vmem:[%s1008_s30] sm:$0xff] (!%p2827_p10)  ;;  %v3615_v2 = vmov (!%p2827_p10), 0.0   ;;  %vm3616_vm1 = vmmov (!%p2827_p10), 0  }
  0xe6   : > { %s4034_s23 = scalar_lea.vmem %s4478_s11, %s2874_s21  ;;  %s4489_s11 = sld [smem:[#allocation52_spill]]  ;;  %2944 = vmatprep.subr.mxu0 (!%p2827_p10), %v3615_v2  ;;  %2946 = vmatprep.mubr.msk.f32.mxu0 (!%p2827_p10), %vm3616_vm1, %v3615_v2  ;;  %vm1074_vm2 = vcmask (!%p2827_p10), 31744   ;;  %v3617_v6 = vmov (!%p2827_p10), 0.0|0.0   ;;  %v2828_v16 = vld [vmem:[#allocation8] ss:$0 sm:$0xff] (!%p2827_p10)  ;;  %vm1168_vm3 = vcmask (!%p2827_p10), 523264  }
  0xe7   : > { %s4039_s8 = scalar_lea.vmem %s4479_s12, %s2874_s21  ;;  %s4490_s12 = sld [smem:[#allocation53_spill]]  ;;  %2945 = vmatpush3.msk.msra.mxu0 (!%p2827_p10), %vm1078_vm0, %v1066_v0  ;;  %3087 = vmatprep.subr.bf16.mxu1 (!%p2827_p10), %v3617_v6  ;;  %v2831_v21 = vld [vmem:[#allocation9] ss:$0 sm:$0xff] (!%p2827_p10)  ;;  %vm1244_vm4 = vcmask (!%p2827_p10), 261120   ;;  %v2833_v35 = vld [vmem:[#allocation11] ss:$0 sm:$0xff] (!%p2827_p10) }
  0xe8   : > { %s4044_s5 = scalar_lea.vmem %s4480_s3, %s2874_s21  ;;  %s4486_s3 = sld [smem:[#allocation49_spill]]  ;;  %2947 = vmatmul.mubr.msk.f32.vlgmr.msra.gmra.mrb[0].mxu0 (!%p2827_p10), %vm1074_vm2, %v1065_v1  ;;  %2965 = vmatprep.mubr.msk.f32.mxu1 (!%p2827_p10), %vm3616_vm1, %v3615_v2 }
  0xe9   : > { %s4054_s9 = scalar_lea.vmem %s4482_s17, %s2878_s29  ;;  %s1048_s24 = scalar_lea.vmem %s4487_s4, %s4020_s16 }
  0xea   : > { %4483 = sst [smem:[#allocation30_spill]] %s4054_s9  ;;  %s4488_s29 = sld [smem:[#allocation51_spill]] }
  0xeb   : > { %s4491_s21 = sld [smem:[#allocation54_spill]]  ;;  %1064 = sbr.rel (%p2827_p10) target bundleno = 976 (0x3d0), region = 140 }
  0xec   : > { %s1054_s26 = scalar_lea.vmem %s4489_s11, %s4020_s16  ;;  %s4492_s9 = sld [smem:[#allocation34_spill]] (!%p2827_p10) }
  0xed   : > { %s1057_s0 = scalar_lea.vmem %s4490_s12, %s4020_s16  ;;  %s4493_s7 = sld [smem:[#allocation38_spill]] (!%p2827_p10) }
  0xee   : > { %s1045_s15 = scalar_lea.vmem %s4486_s3, %s4020_s16  ;;  %s4088_s3 = scalar_lea.vmem [#allocation12], %s2815_s1 }
  0xf0   : > { %s1051_s14 = scalar_lea.vmem %s4488_s29, %s4020_s16 }
  0xf1   : > { %s1060_s18 = scalar_lea.vmem %s4491_s21, %s4020_s16 }
  0xf2   : > { %v1153_v3 = vld [vmem:[%s4492_s9] sm:$0xff]  ;;  %v1154_v4 = vld [vmem:[%s4492_s9 + $0x8] sm:$0xff]  ;;  %v1155_v5 = vld [vmem:[%s4492_s9 + $0x10] sm:$0xff] }
  0xf3   : > { %v3088_v7 = vpack.c.bf16 %v1154_v4, %v1153_v3  ;;  %v1156_v8 = vld [vmem:[%s4492_s9 + $0x18] sm:$0xff]  ;;  %v1157_v10 = vld [vmem:[%s4492_s9 + $0x20] sm:$0xff]  ;;  %v1158_v11 = vld [vmem:[%s4492_s9 + $0x28] sm:$0xff] }
  0xf4   : > { %v3091_v9 = vpack.c.bf16 %v1156_v8, %v1155_v5  ;;  %v3094_v12 = vpack.c.bf16 %v1158_v11, %v1157_v10  ;;  %v1159_v13 = vld [vmem:[%s4492_s9 + $0x30] sm:$0xff]  ;;  %v1160_v14 = vld [vmem:[%s4492_s9 + $0x38] sm:$0xff]  ;;  %v2834_v37 = vld [vmem:[%s4493_s7] ss:$0 sm:$0xff] }
  0xf5   : > { %3089 = vmatpush3.bf16.msra.mxu1 %v3088_v7  ;;  %v3097_v15 = vpack.c.bf16 %v1160_v14, %v1159_v13 }
  0xf6   : > { %3090 = vmatprep.subr.bf16.mxu1 %v3617_v6 }
  0xf9   : > { %3092 = vmatpush3.bf16.msra.mxu1 %v3091_v9 }
  0xfa   : > { %3093 = vmatprep.subr.bf16.mxu1 %v3617_v6 }
  0xfd   : > { %3095 = vmatpush3.bf16.msra.mxu1 %v3094_v12 }
  0xfe   : > { %3096 = vmatprep.subr.bf16.mxu1 %v3617_v6 }
 0x101   : > { %3098 = vmatpush3.bf16.msra.mxu1 %v3097_v15 }
 0x1bb   : > { %v1148_v17 = vpop.f32.mrb[0].mxu0 }
 0x1bc   : > { %v1149_v18 = vadd.f32 %v2828_v16, %v1148_v17  ;;  %v2948_v19 = vpop.f32.mrb[1].mxu0 }
 0x1be   : > { %v1152_v20 = vmax.f32 %v1149_v18, 0.0 }
 0x1c0   : > { %2966 = vmatmul.mubr.msk.f32.vlgmr.msra.gmra.mrb[0].mxu1 %vm1168_vm3, %v1152_v20 }
 0x293   : > { %v1238_v22 = vpop.f32.mrb[0].mxu1 }
 0x294   : > { %v1239_v23 = vadd.f32 %v2831_v21, %v1238_v22  ;;  %v2967_v24 = vpop.f32.mrb[1].mxu1 }
 0x296   : > { %v1245_v25 = vsel %vm1244_vm4, %v1239_v23, 0.0 }
 0x297   : > { %1246 = vadd.xlane.f32.xlu0 %v1245_v25 }
 0x324   : > { %v1247_v26 = vpop.xlane.xlu0 %1246 }
 0x325   : > { %v1249_v27 = vmul.f32 0.03125, %v1247_v26 }
 0x327   : > { %v1250_v28 = vsub.f32 %v1239_v23, %v1249_v27 }
 0x329   : > { %v1251_v29 = vmul.f32 %v1250_v28, %v1250_v28 }
 0x32b   : > { %v1252_v30 = vsel %vm1244_vm4, %v1251_v29, 0.0 }
 0x32c   : > { %1253 = vadd.xlane.f32.xlu0 %v1252_v30 }
 0x3b9   : > { %v1254_v31 = vpop.xlane.xlu0 %1253 }
 0x3ba   : > { %v1255_v32 = vmul.f32 0.03125, %v1254_v31 }
 0x3bc   : > { %v1256_v33 = vadd.f32 1e-05, %v1255_v32 }
 0x3be   : > { %3299 = vrsqrt.f32 %v1256_v33 }
 0x3c8   : > { %v3300_v34 = vpop.eup %3299 }
 0x3c9   : > { %v1258_v36 = vmul.f32 %v3300_v34, %v1250_v28 }
 0x3cb   : > { %v1265_v38 = vmul.f32 %v2833_v35, %v1258_v36 }
 0x3cd   : > { %v1272_v39 = vadd.f32 %v2834_v37, %v1265_v38 }
 0x3cf   : > { %1273 = vst.msk [vmem:[#allocation2] sm:$0xff] %vm1244_vm4, %v1272_v39 }
 0x3d0 PF: > { %v1277_v40 = vld [vmem:[%s4029_s25] sm:$0xff]  ;;  %v1278_v41 = vld [vmem:[%s4029_s25 + $0x8] sm:$0xff]  ;;  %v1279_v42 = vld [vmem:[%s4029_s25 + $0x10] sm:$0xff]  ;;  %v3618_v43 = vmov 0.0|0.0   ;;  %vm3619_vm5 = vmmov 0   ;;  %v3620_v46 = vmov 0.0  }
 0x3d1   : > { %3099 = vmatprep.subr.bf16.mxu1 %v3618_v43  ;;  %v3100_v44 = vpack.c.bf16 %v1278_v41, %v1277_v40  ;;  %v1280_v45 = vld [vmem:[%s4029_s25 + $0x18] sm:$0xff]  ;;  %2976 = vmatprep.mubr.msk.f32.mxu1 %vm3619_vm5, %v3620_v46  ;;  %v1363_v47 = vld [vmem:[%s4034_s23] sm:$0xff]  ;;  %v1364_v48 = vld [vmem:[%s4034_s23 + $0x8] sm:$0xff]  ;;  %vm1288_vm6 = vcmask 261120   ;;  %s4494_s22 = sld [smem:[#allocation47_spill]]  ;;  %s4496_s4 = sld [smem:[#allocation46_spill]] }
 0x3d2   : > { %3113 = vmatprep.subr.bf16.mxu0 %v3618_v43  ;;  %2994 = vmatprep.mubr.msk.f32.mxu0 %vm3619_vm5, %v3620_v46  ;;  %v3103_v49 = vpack.c.bf16 %v1280_v45, %v1279_v42  ;;  %v3105_v50 = vpack.c.bf16 %v1364_v48, %v1363_v47  ;;  %v1365_v51 = vld [vmem:[%s4034_s23 + $0x10] sm:$0xff]  ;;  %v1366_v52 = vld [vmem:[%s4034_s23 + $0x18] sm:$0xff]  ;;  %vm1476_vm7 = vcmask 64512   ;;  %s3622_s29 = smov 120   ;;  %s3623_s17 = smov 112   ;;  %vm1781_vm9 = vcmask 130048  }
 0x3d3   : > { %3101 = vmatpush3.bf16.msra.mxu1 %v3100_v44  ;;  %v3109_v54 = vpack.c.bf16 %v1366_v52, %v1365_v51  ;;  %v1275_v55 = vld [vmem:[%s4001_s20] sm:$0xff]  ;;  %v1276_v56 = vld [vmem:[%s4001_s20 + $0x8] sm:$0xff]  ;;  %vm4159_vm8 = vmpackc.low %vm1476_vm7, %vm1476_vm7  ;;  %s3621_s20 = smov 104   ;;  %s3624_s11 = smov 96   ;;  %vm2156_vm10 = vcmask 195584   ;;  %vm2373_vm11 = vcmask 523264  }
 0x3d4   : > { %3102 = vmatprep.subr.bf16.mxu1 %v3618_v43  ;;  %s3625_s13 = smov 16   ;;  %s3626_s12 = smov 8  }
 0x3d5   : > { %s3627_s19 = smov 24   ;;  %s4500_s10 = sld [smem:[#allocation48_spill]] }
 0x3d6   : > { %v4136_v53 = vld [vmem:[#allocation2] sm:$0xff]  ;;  %s4502_s7 = sld [smem:[#allocation30_spill]]  ;;  %p2866_p6 = scmp.ne.s32.totalorder %s3590_s28, 1 }
 0x3d7   : > { %3104 = vmatpush3.bf16.msra.mxu1 %v3103_v49  ;;  %s4495_s1 = scalar_lea.vmem %s4494_s22, %s4020_s16  ;;  %s4497_s27 = scalar_lea.vmem %s4496_s4, %s4020_s16 }
 0x3d8   : > { %3106 = vmatprep.subr.bf16.mxu1 %v3105_v50  ;;  %v2837_v59 = vld [vmem:[%s4495_s1] ss:$0 sm:$0xff]  ;;  %s4509_s28 = sld [smem:[#allocation39_spill]] (!%p2866_p6) }
 0x3d9   : > { %v2835_v60 = vld [vmem:[%s4497_s27] ss:$0 sm:$0xff] }
 0x3da   : > { %2977 = vmatmul.mubr.msk.f32.vlgmr.msra.gmra.mrb[0].mxu1 %vm1288_vm6, %v4136_v53 }
 0x3db   : > { %3108 = vmatpush3.bf16.msra.mxu1 %v3105_v50  ;;  %2987 = vmatprep.mubr.msk.f32.mxu1 %vm1288_vm6, %v1275_v55  ;;  %s4501_s6 = scalar_lea.vmem %s4500_s10, %s4020_s16 }
 0x3dc   : > { %3110 = vmatprep.subr.bf16.mxu1 %v3109_v54 }
 0x3df   : > { %3112 = vmatpush3.bf16.msra.mxu1 %v3109_v54 }
 0x3e0   : > { %3117 = vmatprep.subr.bf16.mxu1 %v3618_v43 }
 0x3e2   : > { %2988 = vmatmul.mubr.msk.f32.vlgmr.msra.gmra.mrb[2].mxu1 %vm1288_vm6, %v1276_v56 }
 0x3e3   : > { %3001 = vmatprep.mubr.msk.f32.mxu1 %vm3619_vm5, %v3620_v46 }
 0x4ad   : > { %v1358_v57 = vpop.f32.mrb[0].mxu1 }
 0x4ae   : > { %v2978_v58 = vpop.f32.mrb[1].mxu1  ;;  %v1359_v1 = vadd.f32 %v2835_v60, %v1358_v57 }
 0x4b0   : > { %v1362_v5 = vmul.f32 0.35355338, %v1359_v1 }
 0x4b5   : > { %v2989_v61 = vpop.f32.mrb[2].mxu1 }
 0x4b6   : > { %v1452_v62 = vadd.f32 %v2989_v61, %v2837_v59  ;;  %v1446_v63 = vpop.f32.mrb[3].mxu1 }
 0x4b7   : > { %v1447_v0 = vadd.f32 %v2837_v59, %v1446_v63 }
 0x4b9   : > { %v3311_v2 = vpack.i.bf16 %v1452_v62, %v1447_v0  ;;  %v3114_v3 = vpack.c.bf16 %v1452_v62, %v1447_v0 }
 0x4bb   : > { %3312 = vrot.lane.b32.xlu1 %v3311_v2, %s3621_s20  ;;  %3302 = vrot.lane.b32.xlu0 %v3311_v2, %s3622_s29 }
 0x4bc   : > { %3116 = vmatpush3.bf16.xpose.msk.msra.mxu0 %vm4159_vm8, %v3114_v3 }
 0x4bd   : > { %3121 = vmatprep.subr.bf16.mxu0 %v3618_v43 }
 0x4bf   : > { %1456 = vrot.lane.b32.xlu1 %v1362_v5, %s3622_s29  ;;  %3307 = vrot.lane.b32.xlu0 %v3311_v2, %s3623_s17 }
 0x4c3   : > { %2995 = vmatmul.mubr.msk.f32.vlgmr.msra.gmra.mrb[0].mxu0 %vm1476_vm7, %v1362_v5  ;;  %1460 = vrot.lane.b32.xlu1 %v1362_v5, %s3621_s20 }
 0x4c4   : > { %1458 = vrot.lane.b32.xlu0 %v1362_v5, %s3623_s17  ;;  %3008 = vmatprep.mubr.msk.f32.mxu0 %vm3619_vm5, %v3620_v46 }
 0x52d   : > { %v4169_v6 = vpop.permute.xlu1 %3312  ;;  %v4171_v7 = vpop.permute.xlu0 %3302 }
 0x52e   : > { %v3315_v8 = vunpack.i.h.bf16 %v4169_v6  ;;  %v3314_v9 = vunpack.i.l.bf16 %v4169_v6  ;;  %v3305_v10 = vunpack.i.h.bf16 %v4171_v7  ;;  %v3304_v11 = vunpack.i.l.bf16 %v4171_v7 }
 0x530   : > { %v3118_v12 = vpack.c.bf16 %v3305_v10, %v3304_v11  ;;  %v3126_v17 = vpack.c.bf16 %v3315_v8, %v3314_v9 }
 0x531   : > { %v4177_v13 = vpop.permute.xlu0 %3307  ;;  %v1457_v18 = vpop.permute.xlu1 %1456 }
 0x532   : > { %v3310_v14 = vunpack.i.h.bf16 %v4177_v13  ;;  %v3309_v15 = vunpack.i.l.bf16 %v4177_v13  ;;  %3120 = vmatpush3.bf16.xpose.msk.msra.mxu1 %vm4159_vm8, %v3118_v12 }
 0x533   : > { %3125 = vmatprep.subr.bf16.mxu1 %v3618_v43 }
 0x534   : > { %v3122_v16 = vpack.c.bf16 %v3310_v14, %v3309_v15 }
 0x535   : > { %v1461_v20 = vpop.permute.xlu1 %1460 }
 0x536   : > { %3124 = vmatpush3.bf16.xpose.msk.msra.mxu0 %vm4159_vm8, %v3122_v16  ;;  %v1459_v19 = vpop.permute.xlu0 %1458 }
 0x537   : > { %3129 = vmatprep.subr.bf16.mxu0 %v3618_v43 }
 0x539   : > { %3002 = vmatmul.mubr.msk.f32.vlgmr.msra.gmra.mrb[4].mxu1 %vm1476_vm7, %v1457_v18 }
 0x53a   : > { %3128 = vmatpush3.bf16.xpose.msk.msra.mxu1 %vm4159_vm8, %v3126_v17  ;;  %3015 = vmatprep.mubr.msk.f32.mxu1 %vm3619_vm5, %v3620_v46 }
 0x53b   : > { %3132 = vmatprep.subr.bf16.mxu1 %v3618_v43 }
 0x53d   : > { %3009 = vmatmul.mubr.msk.f32.vlgmr.msra.gmra.mrb[2].mxu0 %vm1476_vm7, %v1459_v19 }
 0x53e   : > { %3022 = vmatprep.mubr.msk.f32.mxu0 %vm3619_vm5, %v3620_v46 }
 0x541   : > { %3016 = vmatmul.mubr.msk.f32.vlgmr.msra.gmra.mrb[6].mxu1 %vm1476_vm7, %v1461_v20 }
 0x542   : > { %3029 = vmatprep.mubr.msk.f32.mxu1 %vm3619_vm5, %v3620_v46 }
 0x596   : > { %v1549_v21 = vpop.f32.mrb[0].mxu0 }
 0x597   : > { %v2996_v22 = vpop.f32.mrb[1].mxu0  ;;  %v1782_v23 = vsel %vm1781_vm9, %v1549_v21, -inf }
 0x598   : > { %1783 = vmax.xlane.f32.xlu0 %v1782_v23  ;;  %v2158_v22 = vld [vmem:[%s4039_s8] sm:$0xff]  ;;  %v2159_v23 = vld [vmem:[%s4039_s8 + $0x8] sm:$0xff] }
 0x60c   : > { %v1625_v24 = vpop.f32.mrb[4].mxu1 }
 0x60d   : > { %v3003_v25 = vpop.f32.mrb[5].mxu1  ;;  %v1785_v26 = vsel %vm1781_vm9, %v1625_v24, -inf }
 0x60e   : > { %1786 = vmax.xlane.f32.xlu1 %v1785_v26  ;;  %v2160_v25 = vld [vmem:[%s4039_s8 + $0x10] sm:$0xff]  ;;  %v2161_v26 = vld [vmem:[%s4039_s8 + $0x18] sm:$0xff] }
 0x610   : > { %v1701_v27 = vpop.f32.mrb[2].mxu0 }
 0x611   : > { %v3010_v28 = vpop.f32.mrb[3].mxu0  ;;  %v1788_v29 = vsel %vm1781_vm9, %v1701_v27, -inf }
 0x612   : > { %1789 = vmax.xlane.f32.xlu0 %v1788_v29 }
 0x614   : > { %v1777_v30 = vpop.f32.mrb[6].mxu1 }
 0x615   : > { %v3017_v31 = vpop.f32.mrb[7].mxu1  ;;  %v1791_v32 = vsel %vm1781_vm9, %v1777_v30, -inf }
 0x616   : > { %1792 = vmax.xlane.f32.xlu0 %v1791_v32 }
 0x61f   : > { %3317 = vrot.lane.b32.xlu1 %v3311_v2, %s3624_s11 }
 0x625   : > { %v1784_v33 = vpop.xlane.xlu0 %1783 }
 0x626   : > { %v1794_v34 = vsub.f32 %v1549_v21, %v1784_v33 }
 0x628   : > { %v1798_v35 = vmul.f32 1.442695, %v1794_v34 }
 0x62a   : > { %3336 = vpow2.f32 %v1798_v35 }
 0x634   : > { %v3337_v36 = vpop.eup %3336 }
 0x635   : > { %v1806_v37 = vsel %vm1781_vm9, %v3337_v36, 0.0 }
 0x643   : > { %1807 = vadd.xlane.f32.xlu1 %v1806_v37 }
 0x69b   : > { %v1787_v38 = vpop.xlane.xlu1 %1786 }
 0x69c   : > { %v1795_v39 = vsub.f32 %v1625_v24, %v1787_v38  ;;  %v3142_v24 = vpack.c.bf16 %v2159_v23, %v2158_v22 }
 0x69e   : > { %v1800_v40 = vmul.f32 1.442695, %v1795_v39 }
 0x69f   : > { %v3318_v41 = vpop.permute.xlu1 %3317  ;;  %v1790_v42 = vpop.xlane.xlu0 %1789 }
 0x6a0   : > { %3338 = vpow2.f32 %v1800_v40  ;;  %v3320_v44 = vunpack.i.h.bf16 %v3318_v41  ;;  %v3319_v45 = vunpack.i.l.bf16 %v3318_v41  ;;  %v1796_v47 = vsub.f32 %v1701_v27, %v1790_v42  ;;  %v2856_v40 = vld [vmem:[%s4501_s6] ss:$0 sm:$0xff] }
 0x6a1   : > { %v3145_v27 = vpack.c.bf16 %v2161_v26, %v2160_v25 }
 0x6a2   : > { %v3130_v48 = vpack.c.bf16 %v3320_v44, %v3319_v45  ;;  %v1802_v49 = vmul.f32 1.442695, %v1796_v47 }
 0x6a3   : > { %v1793_v50 = vpop.xlane.xlu0 %1792 }
 0x6a4   : > { %3340 = vpow2.f32 %v1802_v49  ;;  %v1797_v51 = vsub.f32 %v1777_v30, %v1793_v50  ;;  %3131 = vmatpush3.bf16.msra.mxu0 %v3130_v48 }
 0x6a5   : > { %3135 = vmatprep.subr.bf16.mxu0 %v3618_v43 }
 0x6a6   : > { %v1804_v52 = vmul.f32 1.442695, %v1797_v51 }
 0x6a8   : > { %3342 = vpow2.f32 %v1804_v52  ;;  %v2273_v52 = vld [vmem:[%s4044_s5] sm:$0xff] }
 0x6aa   : > { %v3339_v54 = vpop.eup %3338 }
 0x6ab   : > { %v1809_v55 = vsel %vm1781_vm9, %v3339_v54, 0.0 }
 0x6ac   : > { %1810 = vadd.xlane.f32.xlu0 %v1809_v55 }
 0x6ae   : > { %v3341_v56 = vpop.eup %3340 }
 0x6af   : > { %v1812_v57 = vsel %vm1781_vm9, %v3341_v56, 0.0 }
 0x6b0   : > { %1813 = vadd.xlane.f32.xlu1 %v1812_v57 }
 0x6b2   : > { %v3343_v58 = vpop.eup %3342 }
 0x6b3   : > { %v1815_v59 = vsel %vm1781_vm9, %v3343_v58, 0.0 }
 0x6b4   : > { %1816 = vadd.xlane.f32.xlu0 %v1815_v59  ;;  %v2359_v59 = vld [vmem:[%s4502_s7 + $0x8] sm:$0xff] }
 0x6c1   : > { %3327 = vrot.lane.b32.xlu1 %v4177_v13, %s3624_s11 }
 0x6c5   : > { %3332 = vrot.lane.b32.xlu1 %v4169_v6, %s3624_s11 }
 0x6ca   : > { %3322 = vrot.lane.b32.xlu0 %v4171_v7, %s3624_s11 }
 0x6d0   : > { %v1808_v60 = vpop.xlane.xlu1 %1807 }
 0x6d1   : > { %3344 = vrcp.f32 %v1808_v60  ;;  %v2360_v60 = vld [vmem:[%s4502_s7 + $0x10] sm:$0xff] }
 0x6db   : > { %v3345_v61 = vpop.eup %3344 }
 0x6dc   : > { %v1822_v62 = vmul.f32 %v3345_v61, %v3337_v36 }
 0x6de   : > { %3023 = vmatmul.mubr.msk.f32.vlgmr.msra.gmra.mrb[4].mxu0 %vm1781_vm9, %v1822_v62  ;;  %v2361_v62 = vld [vmem:[%s4502_s7 + $0x18] sm:$0xff] }
 0x6df   : > { %3036 = vmatprep.mubr.msk.f32.mxu0 %vm3619_vm5, %v3620_v46 }
 0x739   : > { %v1811_v63 = vpop.xlane.xlu0 %1810 }
 0x73a   : > { %3346 = vrcp.f32 %v1811_v63  ;;  %v3157_v63 = vpack.c.bf16 %v2361_v62, %v2360_v60 }
 0x73d   : > { %v1814_v0 = vpop.xlane.xlu1 %1813 }
 0x73e   : > { %3348 = vrcp.f32 %v1814_v0  ;;  %v2362_v0 = vld [vmem:[%s4502_s7 + $0x20] sm:$0xff] }
 0x741   : > { %v3328_v1 = vpop.permute.xlu1 %3327  ;;  %v1817_v2 = vpop.xlane.xlu0 %1816 }
 0x742   : > { %v3330_v3 = vunpack.i.h.bf16 %v3328_v1  ;;  %v3329_v4 = vunpack.i.l.bf16 %v3328_v1  ;;  %3350 = vrcp.f32 %v1817_v2  ;;  %v2363_v1 = vld [vmem:[%s4502_s7 + $0x28] sm:$0xff] }
 0x743   : > { %v3160_v2 = vpack.c.bf16 %v2363_v1, %v2362_v0 }
 0x744   : > { %v3136_v5 = vpack.c.bf16 %v3330_v3, %v3329_v4  ;;  %v3347_v10 = vpop.eup %3346 }
 0x745   : > { %v3333_v6 = vpop.permute.xlu1 %3332  ;;  %v3323_v7 = vpop.permute.xlu0 %3322  ;;  %v1823_v16 = vmul.f32 %v3347_v10, %v3339_v54  ;;  %v2274_v54 = vld [vmem:[%s4044_s5 + $0x8] sm:$0xff] }
 0x746   : > { %v3325_v8 = vunpack.i.h.bf16 %v3323_v7  ;;  %v3324_v9 = vunpack.i.l.bf16 %v3323_v7  ;;  %3137 = vmatpush3.bf16.msra.mxu0 %v3136_v5  ;;  %v3335_v12 = vunpack.i.h.bf16 %v3333_v6  ;;  %v3334_v13 = vunpack.i.l.bf16 %v3333_v6  ;;  %v2858_v7 = vld [vmem:[%s1045_s15] ss:$0 sm:$0xff] }
 0x747   : > { %3141 = vmatprep.subr.bf16.mxu0 %v3618_v43  ;;  %v3148_v55 = vpack.c.bf16 %v2274_v54, %v2273_v52 }
 0x748   : > { %v3349_v11 = vpop.eup %3348  ;;  %v3133_v14 = vpack.c.bf16 %v3325_v8, %v3324_v9  ;;  %v3139_v18 = vpack.c.bf16 %v3335_v12, %v3334_v13  ;;  %v2859_v9 = vld [vmem:[%s1048_s24] ss:$0 sm:$0xff]  ;;  %v2365_v12 = vld [vmem:[%s4502_s7 + $0x38] sm:$0xff] }
 0x749   : > { %v1824_v15 = vmul.f32 %v3349_v11, %v3341_v56  ;;  %v2276_v56 = vld [vmem:[%s4044_s5 + $0x18] sm:$0xff]  ;;  %v2364_v11 = vld [vmem:[%s4502_s7 + $0x30] sm:$0xff] }
 0x74a   : > { %3134 = vmatpush3.bf16.msra.mxu1 %v3133_v14  ;;  %v3163_v13 = vpack.c.bf16 %v2365_v12, %v2364_v11  ;;  %v2860_v14 = vld [vmem:[%s1051_s14] ss:$0 sm:$0xff] }
 0x74b   : > { %3037 = vmatmul.mubr.msk.f32.vlgmr.msra.gmra.mrb[6].mxu0 %vm1781_vm9, %v1824_v15  ;;  %3138 = vmatprep.subr.bf16.mxu1 %v3618_v43 }
 0x74c   : > { %v3351_v17 = vpop.eup %3350  ;;  %3054 = vmatprep.mubr.msk.f32.mxu0 %vm3619_vm5, %v3620_v46  ;;  %3143 = vmatpush3.bf16.msra.mxu0 %v3142_v24 }
 0x74d   : > { %3030 = vmatmul.mubr.msk.f32.vlgmr.msra.gmra.mrb[8].mxu1 %vm1781_vm9, %v1823_v16  ;;  %v1825_v19 = vmul.f32 %v3351_v17, %v3343_v58  ;;  %3144 = vmatprep.subr.bf16.mxu0 %v3618_v43  ;;  %v2358_v58 = vld [vmem:[%s4502_s7] sm:$0xff] }
 0x74e   : > { %3140 = vmatpush3.bf16.msra.mxu1 %v3139_v18  ;;  %3043 = vmatprep.mubr.msk.f32.mxu1 %vm3619_vm5, %v3620_v46  ;;  %v3154_v61 = vpack.c.bf16 %v2359_v59, %v2358_v58 }
 0x74f   : > { %3147 = vmatprep.subr.bf16.mxu1 %v3618_v43 }
 0x750   : > { %3146 = vmatpush3.bf16.msra.mxu0 %v3145_v27 }
 0x751   : > { %3044 = vmatmul.mubr.msk.f32.vlgmr.msra.gmra.mrb[10].mxu1 %vm1781_vm9, %v1825_v19  ;;  %3153 = vmatprep.subr.bf16.mxu0 %v3618_v43  ;;  %v2862_v19 = vld [vmem:[%s1054_s26] ss:$0 sm:$0xff] }
 0x752   : > { %3065 = vmatprep.mubr.msk.f32.mxu1 %vm3619_vm5, %v3620_v46  ;;  %3149 = vmatpush3.bf16.msra.mxu1 %v3148_v55 }
 0x753   : > { %3150 = vmatprep.subr.bf16.mxu1 %v3618_v43 }
 0x7b1   : > { %v1901_v20 = vpop.f32.mrb[4].mxu0 }
 0x7b2   : > { %v3024_v21 = vpop.f32.mrb[5].mxu0 }
 0x81e   : > { %v2059_v28 = vpop.f32.mrb[6].mxu0 }
 0x81f   : > { %2147 = vrot.lane.b32.xlu1 %v2059_v28, %s3625_s13  ;;  %v3038_v29 = vpop.f32.mrb[7].mxu0 }
 0x820   : > { %v1980_v30 = vpop.f32.mrb[8].mxu1 }
 0x821   : > { %2143 = vrot.lane.b32.xlu0 %v1980_v30, %s3626_s12  ;;  %v3031_v31 = vpop.f32.mrb[9].mxu1 }
 0x824   : > { %v2138_v32 = vpop.f32.mrb[10].mxu1 }
 0x825   : > { %2151 = vrot.lane.b32.xlu0 %v2138_v32, %s3627_s19  ;;  %v3045_v33 = vpop.f32.mrb[11].mxu1  ;;  %s4510_s19 = sld [smem:[#allocation40_spill]] (!%p2866_p6) }
 0x82b   : > { %v2868_v52 = vld [vmem:[%s4510_s19] ss:$0 sm:$0xff] (!%p2866_p6) }
 0x891   : > { %v2148_v36 = vpop.permute.xlu1 %2147 }
 0x893   : > { %v2144_v34 = vpop.permute.xlu0 %2143 }
 0x894   : > { %v2154_v35 = vsel %vm1476_vm7, %v1901_v20, %v2144_v34  ;;  %v2864_v34 = vld [vmem:[%s1057_s0] ss:$0 sm:$0xff] }
 0x895   : > { %v2155_v38 = vsel %vm1781_vm9, %v2154_v35, %v2148_v36  ;;  %v2865_v36 = vld [vmem:[%s1060_s18] ss:$0 sm:$0xff] }
 0x897   : > { %v2152_v37 = vpop.permute.xlu0 %2151 }
 0x898   : > { %v2157_v39 = vsel %vm2156_vm10, %v2155_v38, %v2152_v37 }
 0x899   : > { %3055 = vmatmul.mubr.msk.f32.vlgmr.msra.gmra.mrb[8].mxu0 %vm1288_vm6, %v2157_v39 }
 0x89a   : > { %3084 = vmatprep.mubr.msk.f32.mxu0 %vm3619_vm5, %v3620_v46  ;;  %3155 = vmatpush3.bf16.msra.mxu0 %v3154_v61 }
 0x89b   : > { %3156 = vmatprep.subr.bf16.mxu0 %v3618_v43 }
 0x89e   : > { %3158 = vmatpush3.bf16.msra.mxu0 %v3157_v63 }
 0x89f   : > { %3159 = vmatprep.subr.bf16.mxu0 %v3618_v43 }
 0x8a2   : > { %3161 = vmatpush3.bf16.msra.mxu0 %v3160_v2 }
 0x8a3   : > { %3162 = vmatprep.subr.bf16.mxu0 %v3618_v43 }
 0x8a6   : > { %3164 = vmatpush3.bf16.msra.mxu0 %v3163_v13 }
 0x96c   : > { %v2238_v41 = vpop.f32.mrb[8].mxu0 }
 0x96d   : > { %v2239_v42 = vadd.f32 %v2856_v40, %v2238_v41  ;;  %v3056_v44 = vpop.f32.mrb[9].mxu0 }
 0x96f   : > { %v2242_v45 = vadd.f32 %v2239_v42, %v4136_v53  ;;  %v2275_v53 = vld [vmem:[%s4044_s5 + $0x10] sm:$0xff] }
 0x970   : > { %v3151_v57 = vpack.c.bf16 %v2276_v56, %v2275_v53 }
 0x971   : > { %v2245_v47 = vsel %vm1288_vm6, %v2242_v45, 0.0 }
 0x972   : > { %2246 = vadd.xlane.f32.xlu1 %v2245_v47  ;;  %3152 = vmatpush3.bf16.msra.mxu1 %v3151_v57 }
 0x9ff   : > { %v2247_v48 = vpop.xlane.xlu1 %2246 }
 0xa00   : > { %v2249_v49 = vmul.f32 0.03125, %v2247_v48 }
 0xa02   : > { %v2250_v46 = vsub.f32 %v2242_v45, %v2249_v49 }
 0xa04   : > { %v2251_v50 = vmul.f32 %v2250_v46, %v2250_v46 }
 0xa06   : > { %v2252_v51 = vsel %vm1288_vm6, %v2251_v50, 0.0  ;;  %v2867_v50 = vld [vmem:[%s4509_s28] ss:$0 sm:$0xff] (!%p2866_p6) }
 0xa07   : > { %2253 = vadd.xlane.f32.xlu0 %v2252_v51 }
 0xa94   : > { %v2254_v3 = vpop.xlane.xlu0 %2253 }
 0xa95   : > { %v2255_v4 = vmul.f32 0.03125, %v2254_v3 }
 0xa97   : > { %v2256_v5 = vadd.f32 1e-06, %v2255_v4 }
 0xa99   : > { %3352 = vrsqrt.f32 %v2256_v5 }
 0xaa3   : > { %v3353_v6 = vpop.eup %3352 }
 0xaa4   : > { %v2258_v8 = vmul.f32 %v3353_v6, %v2250_v46 }
 0xaa6   : > { %v2265_v10 = vmul.f32 %v2858_v7, %v2258_v8 }
 0xaa8   : > { %v2272_v43 = vadd.f32 %v2859_v9, %v2265_v10 }
 0xaaa   : > { %3066 = vmatmul.mubr.msk.f32.vlgmr.msra.gmra.mrb[12].mxu1 %vm1288_vm6, %v2272_v43 }
 0xb7d   : > { %v2353_v15 = vpop.f32.mrb[12].mxu1 }
 0xb7e   : > { %v2354_v16 = vadd.f32 %v2860_v14, %v2353_v15  ;;  %v3067_v17 = vpop.f32.mrb[13].mxu1 }
 0xb80   : > { %v2357_v18 = vmax.f32 %v2354_v16, 0.0 }
 0xb82   : > { %3085 = vmatmul.mubr.msk.f32.vlgmr.msra.gmra.mrb[10].mxu0 %vm2373_vm11, %v2357_v18 }
 0xc55   : > { %v2443_v20 = vpop.f32.mrb[10].mxu0 }
 0xc56   : > { %v2444_v21 = vadd.f32 %v2862_v19, %v2443_v20  ;;  %v3086_v22 = vpop.f32.mrb[11].mxu0 }
 0xc58   : > { %v2447_v23 = vadd.f32 %v2444_v21, %v2272_v43 }
 0xc5a   : > { %v2450_v24 = vsel %vm1288_vm6, %v2447_v23, 0.0 }
 0xc5b   : > { %2451 = vadd.xlane.f32.xlu0 %v2450_v24 }
 0xce8   : > { %v2452_v25 = vpop.xlane.xlu0 %2451 }
 0xce9   : > { %v2453_v26 = vmul.f32 0.03125, %v2452_v25 }
 0xceb   : > { %v2454_v27 = vsub.f32 %v2447_v23, %v2453_v26 }
 0xced   : > { %v2455_v28 = vmul.f32 %v2454_v27, %v2454_v27 }
 0xcef   : > { %v2456_v29 = vsel %vm1288_vm6, %v2455_v28, 0.0 }
 0xcf0   : > { %2457 = vadd.xlane.f32.xlu1 %v2456_v29 }
 0xd7d   : > { %v2458_v30 = vpop.xlane.xlu1 %2457 }
 0xd7e   : > { %v2459_v31 = vmul.f32 0.03125, %v2458_v30 }
 0xd80   : > { %v2460_v32 = vadd.f32 1e-06, %v2459_v31 }
 0xd82   : > { %3354 = vrsqrt.f32 %v2460_v32 }
 0xd8c   : > { %v3355_v33 = vpop.eup %3354 }
 0xd8d   : > { %v2462_v35 = vmul.f32 %v3355_v33, %v2454_v27  ;;  %2481 = sbr.rel (%p2866_p6) target bundleno = 3789 (0xecd), region = 144 }
 0xd8f   : > { %v2469_v37 = vmul.f32 %v2864_v34, %v2462_v35 }
 0xd91   : > { %v2476_v38 = vadd.f32 %v2865_v36, %v2469_v37 }
 0xd93   : > { %2477 = vst.msk [vmem:[#allocation2] sm:$0xff] %vm1288_vm6, %v2476_v38  ;;  %v2484_v39 = vsel (!%p2866_p6), %vm1288_vm6, %v2476_v38, 0.0 }
 0xd94   : > { %2485 = vadd.xlane.f32.xlu0 %v2484_v39 }
 0xe21   : > { %v2486_v40 = vpop.xlane.xlu0 %2485 }
 0xe22   : > { %v2487_v41 = vmul.f32 0.03125, %v2486_v40 }
 0xe24   : > { %v2488_v42 = vsub.f32 %v2476_v38, %v2487_v41 }
 0xe26   : > { %v2489_v44 = vmul.f32 %v2488_v42, %v2488_v42 }
 0xe28   : > { %v2490_v45 = vsel %vm1288_vm6, %v2489_v44, 0.0 }
 0xe29   : > { %2491 = vadd.xlane.f32.xlu0 %v2490_v45 }
 0xeb6   : > { %v2492_v47 = vpop.xlane.xlu0 %2491 }
 0xeb7   : > { %v2493_v48 = vmul.f32 0.03125, %v2492_v47 }
 0xeb9   : > { %v2494_v49 = vadd.f32 1e-06, %v2493_v48 }
 0xebb   : > { %3356 = vrsqrt.f32 %v2494_v49 }
 0xec5   : > { %v3357_v46 = vpop.eup %3356 }
 0xec6   : > { %v2496_v51 = vmul.f32 %v3357_v46, %v2488_v42 }
 0xec8   : > { %v2503_v54 = vmul.f32 %v2867_v50, %v2496_v51 }
 0xeca   : > { %v2510_v55 = vadd.f32 %v2868_v52, %v2503_v54 }
 0xecc   : > { %2511 = vst.msk [vmem:[%s4088_s3] sm:$0xff] %vm1288_vm6, %v2510_v55 }
 0xecd PF: > { %s4511_s8 = sld [smem:[#allocation20_spill]]  ;;  %s4512_s21 = sld [smem:[#allocation29_spill]] }
 0xece   : > { %s4514_s23 = sld [smem:[#allocation55_spill]]  ;;  %s2526_s22 = sshll.u32 %s4088_s3, 4  ;;  %s2527_s22 = int_to_ptr.vmem [resolvable:$true] %s2526_s22 }
 0xecf   : > { %s3500_s2 = scalar_lea.vmem %s2527_s22, 128  ;;  %s3628_s30 = smov [#allocation12]  }
 0xed0   : > { %p3501_p8 = scmp.ne.s32.totalorder %s2527_s22, %s3500_s2  ;;  %s3504_s4 = sshll.u32 %s3628_s30, 4  ;;  %s3505_s4 = int_to_ptr.vmem [resolvable:$false] %s3504_s4 }
 0xed1   : > { %s3506_s27 = scalar_lea.vmem %s3505_s4, 256  ;;  %p3507_p12 = scmp.lt.s32.totalorder %s2527_s22, %s3505_s4 }
 0xed2   : > { %p3502_p3 = pnand %p3501_p8, %p3939_p4  ;;  %p3508_p11 = scmp.lt.s32.totalorder %s3506_s27, %s3500_s2 }
 0xed3   : > { %s2870_s6 = sshll.u32 %s4511_s8, 7  ;;  %s2513_s1 = scalar_lea.sflag [#allocation5], %s4512_s21 }
 0xed4   : > { %s4314_s25 = scalar_lea.hbm %s4514_s23, %s2870_s6  ;;  %p3503_p7 = pneg %p3502_p3 }
 0xed5   : > { %p3509_p13 = por %p3508_p11, %p3507_p12 }
 0xed7   : > { %p3510_p5 = pnand %p3509_p13, %p3503_p7 }
 0xed9   : > { %3513 = shalt.err (!%p3510_p5)
}
 0xeda   : > { %s3514_s3 = scalar_lea.hbm %s4314_s25, 128  ;;  %s3518_s20 = scalar_lea.hbm %s4514_s23, 256 }
 0xedb   : > { %p3515_p9 = scmp.ne.s32.totalorder %s4314_s25, %s3514_s3  ;;  %p3519_p2 = scmp.lt.u32.totalorder %s4314_s25, %s4514_s23 }
 0xedc   : > { %p3520_p10 = scmp.lt.u32.totalorder %s3518_s20, %s3514_s3  ;;  %p3522_p8 = scmp.lt.u32.totalorder %s3514_s3, %s4314_s25 }
 0xedd   : > { %p3516_p0 = pnand %p3515_p9, %p3939_p4 }
 0xede   : > { %p3521_p6 = por %p3520_p10, %p3519_p2 }
 0xedf   : > { %p3517_p1 = pneg %p3516_p0 }
 0xee0   : > { %p3523_p3 = por %p3522_p8, %p3521_p6 }
 0xee2   : > { %p3524_p7 = pnand %p3523_p3, %p3517_p1 }
 0xee4   : > { %3527 = shalt.err (!%p3524_p7)
}
 0xee5   : > { %3183 = dma.vmem_to_hbm [thread:$0]  (%p3939_p4), %s2527_s22, 128, %s4314_s25, %s2513_s1  }
 0xee6 PF: > { %s4515_s29 = sld [smem:[#allocation23_spill]]  ;;  %s4516_s17 = sld [smem:[#allocation17_spill]] }
 0xee7   : > { %s4517_s11 = sld [smem:[#allocation24_spill]] }
 0xeec   : > { %p3215_p12 = scmp.ge.s32.totalorder %s4515_s29, 2  ;;  %s2538_s13 = sand.u32 1, %s4516_s17  }
 0xeed   : > { %p4518_p11 = scmp.ne.s32.totalorder %s4517_s11, 0  ;;  %s2539_s16 = scalar_lea.sflag [#allocation5], %s2538_s13 }
 0xeef   : > { %p3203_p13 = pnand %p3215_p12, %p4518_p11 }
 0xef1   : > { %3573 = dma.done.wait (!%p3203_p13), %s2539_s16, 128  }
 0xef2   : > { %3575 = vsyncadd (!%p3203_p13), %s2539_s16, 4294967168  ;;  %s42_s0 = sadd.s32 1, %s4515_s29   ;;  %s4519_s5 = sld [smem:[#allocation18_spill]] }
 0xef3   : > { %p39_p5 = scmp.ge.s32.totalorder %s42_s0, 6   ;;  %s4520_s26 = sld [smem:[#allocation19_spill]] }
 0xef4   : > { %s4521_s27 = sld [smem:[#allocation28_spill]]  ;;  %s4522_s28 = sld [smem:[#allocation21_spill]] }
 0xef5   : > { %s4523_s6 = sld [smem:[#allocation22_spill]]  ;;  %s4524_s2 = sld [smem:[#allocation25_spill]] }
 0xef6   : > { %s4525_s29 = sld [smem:[#allocation27_spill]]  ;;  %41 = sbr.rel (!%p39_p5) target bundleno = 35 (0x23), region = 230 }
 0xefd   :  { %2544 = vsyncpa [#allocation4], 1 }
 0xefe   :  { %2546 = vsyncpa [#allocation4 + $0x1], 1 }
 0xeff   :  { %2547 = vsyncpa [#allocation7], 1 }
 0xf00   :  { %2548 = vsyncpa [#allocation10], 1 }
 0xf01   :  { %2549 = vsyncpa [#allocation5], 1 }
 0xf02   :  { %2551 = vsyncpa [#allocation5 + $0x1], 1 }

</bundles_post_ra>
